<compile_context>
chip_gen: v6e
topology: v6e:2x2x1
jax: 0.10.0
libtpu: 0.0.40
codegen_flags: <defaults>
</compile_context>

<pallas_src>
import math

import jax
import jax.numpy as jnp
from jax.experimental import pallas as pl
from jax.experimental.pallas import tpu as pltpu

# ----- small, module-consistent configuration -----
INPUT_DIM = 16     # mel feature dim (module default 80)
EMBED = 32         # d_model       (module default 256)
NHEAD = 4
HEAD_DIM = EMBED // NHEAD
FF_DIM = 64        # dim_feedforward (module default 512)
NUM_LAYERS = 2     # (module default 4)
OUTPUT_DIM = 16    # (module default 80)
LN_EPS = 1e-5
LANE = 128


def _layer_norm(x, w, b, eps=LN_EPS):
    mean = jnp.mean(x, axis=-1, keepdims=True)
    var = jnp.mean((x - mean) ** 2, axis=-1, keepdims=True)
    return (x - mean) * jax.lax.rsqrt(var + eps) * w + b


def _make_kernel(T):
    """Kernel body for one batch element (grid iterates over B)."""
    E, D, H, L, FF = EMBED, HEAD_DIM, NHEAD, NUM_LAYERS, FF_DIM

    def kernel(x_ref, pe_ref, w_in_ref, wqkv_ref, wout_ref,
               wff1_ref, wff2_ref, w_out_ref, vec_ref, o_ref):
        def vrow(r, n):
            return vec_ref[r:r + 1, :n]                     # (1, n) zero-cost static view

        # ----- input_proj (lane-dense, K padded to 128) + positional encoding -----
        x = x_ref[...]                                      # (T, 128)
        h = jnp.dot(x, w_in_ref[...], preferred_element_type=jnp.float32)
        h = h + vrow(0, E) + pe_ref[...]                    # (T, E)

        row = 1
        for l in range(L):                                  # static unrolled layer loop
            # ---------- self-attention: fused QKV, head-batched einsums ----------
            # 1/sqrt(D) is pre-folded into the q columns of wqkv / its bias row.
            qkv = jnp.dot(h, wqkv_ref[l],
                          preferred_element_type=jnp.float32) + vrow(row, 3 * E)   # (T, 3E)
            q = jnp.swapaxes(qkv[:, 0 * E:1 * E].reshape(T, H, D), 0, 1)            # (H, T, D)
            k = jnp.swapaxes(qkv[:, 1 * E:2 * E].reshape(T, H, D), 0, 1)
            v = jnp.swapaxes(qkv[:, 2 * E:3 * E].reshape(T, H, D), 0, 1)

            s = jnp.einsum('htd,hsd->hts', q, k,
                           preferred_element_type=jnp.float32)                      # (H, T, T)
            s = s - jnp.max(s, axis=-1, keepdims=True)
            p = jnp.exp(s)
            p = p * pl.reciprocal(jnp.sum(p, axis=-1, keepdims=True), approx=True)
            o = jnp.einsum('hts,hsd->htd', p, v,
                           preferred_element_type=jnp.float32)                      # (H, T, D)

            # head-major concat along lanes == PyTorch MHA layout, then one matmul
            o = jnp.swapaxes(o, 0, 1).reshape(T, E)                                  # (T, E)
            attn = jnp.dot(o, wout_ref[l],
                           preferred_element_type=jnp.float32) + vrow(row + 1, E)
            # TODO(synk): dropout(p=0.1) after attention is identity here (eval mode).
            h = _layer_norm(h + attn, vrow(row + 2, E), vrow(row + 3, E))

            # ---------- feed-forward block ----------
            ff = jnp.dot(h, wff1_ref[l],
                         preferred_element_type=jnp.float32) + vrow(row + 4, FF)
            ff = jnp.maximum(ff, 0.0)                       # ReLU
            ff = jnp.dot(ff, wff2_ref[l],
                         preferred_element_type=jnp.float32) + vrow(row + 5, E)
            h = _layer_norm(h + ff, vrow(row + 6, E), vrow(row + 7, E))
            row += 8

        # ----- output_proj: lane-dense 128-wide store (cols >= OUTPUT_DIM stay zero) -----
        out = jnp.dot(h, w_out_ref[...], preferred_element_type=jnp.float32)
        out = out + vec_ref[row:row + 1, :]                 # padded output-bias row
        o_ref[...] = out

    return kernel


def vocalnet_forward(meow, params):
    """meow: (B, T, INPUT_DIM) float32 -> (B, T, OUTPUT_DIM) float32."""
    B, T, F = meow.shape
    assert F == INPUT_DIM
    assert T % 8 == 0, "T must be sublane-aligned for the (T, 128) block"
    M = B * T
    E, D, H, L, FF = EMBED, HEAD_DIM, NHEAD, NUM_LAYERS, FF_DIM
    scale = 1.0 / math.sqrt(D)

    # ----------- plain-JAX layout plumbing (done once, outside the kernel) -----------
    # NOTE: at module-default sizes (E=256, FF=512, T~1000) matmul operands should be
    # cast to bf16 here (keep LN/softmax math f32 — esp. on v5e), and attention must
    # be tiled flash-style over kv with pltpu.CompilerParams(vmem_limit_bytes=...),
    # since a monolithic (H,T,T) score tensor would not fit VMEM.  At toy sizes the
    # monolithic f32 path is optimal.
    x_pad = jnp.zeros((M, LANE), jnp.float32).at[:, :F].set(meow.reshape(M, F))
    pe = params["pe"][:T]                                                    # (T, E)
    w_in_pad = jnp.zeros((LANE, E), jnp.float32).at[:F, :].set(params["w_in"].T)

    # fused QKV weight (L, E, 3E); fold 1/sqrt(D) into the q columns (and q bias)
    wqkv = jnp.swapaxes(params["in_proj_w"], -1, -2)                         # (L, E, 3E)
    wqkv = wqkv.at[:, :, :E].multiply(scale)
    bqkv = params["in_proj_b"].at[:, :E].multiply(scale)                     # (L, 3E)

    wout = jnp.swapaxes(params["out_proj_w"], -1, -2)                        # (L, E, E)
    wff1 = jnp.swapaxes(params["lin1_w"], -1, -2)                            # (L, E, FF)
    wff2 = jnp.swapaxes(params["lin2_w"], -1, -2)                            # (L, FF, E)
    w_out_pad = jnp.zeros((E, LANE), jnp.float32).at[:, :OUTPUT_DIM].set(params["w_out"].T)

    # Pack all biases / LayerNorm params into one (rows, 128) slab.
    def pad_row(v):
        return jnp.zeros((LANE,), jnp.float32).at[:v.shape[0]].set(v)

    rows = [pad_row(params["b_in"])]
    for l in range(L):
        rows += [pad_row(bqkv[l]),
                 pad_row(params["out_proj_b"][l]),
                 pad_row(params["ln1_w"][l]), pad_row(params["ln1_b"][l]),
                 pad_row(params["lin1_b"][l]), pad_row(params["lin2_b"][l]),
                 pad_row(params["ln2_w"][l]), pad_row(params["ln2_b"][l])]
    rows.append(pad_row(params["b_out"]))                                    # cols>=OUT stay 0
    vec = jnp.stack(rows)
    extra = (-vec.shape[0]) % 8
    if extra:
        vec = jnp.pad(vec, ((0, extra), (0, 0)))

    weights = (pe, w_in_pad, wqkv, wout, wff1, wff2, w_out_pad, vec)

    def pinned(a):
        nd = a.ndim
        return pl.BlockSpec(a.shape, lambda b, _nd=nd: (0,) * _nd)

    in_specs = [pl.BlockSpec((T, LANE), lambda b: (b, 0))] + [pinned(a) for a in weights]
    out_spec = pl.BlockSpec((T, LANE), lambda b: (b, 0))

    # Advisory cost estimate for XLA's scheduler.
    flops = B * (2 * T * LANE * E
                 + L * (2 * T * E * 3 * E + 4 * H * T * T * D
                        + 2 * T * E * E + 4 * T * E * FF)
                 + 2 * T * E * LANE)
    transcendentals = B * L * (H * T * T + H * T + 4 * T)
    bytes_accessed = (int(x_pad.size) * 4 + M * LANE * 4
                      + sum(int(a.size) * a.dtype.itemsize for a in weights))
    cost = pl.CostEstimate(flops=int(flops), transcendentals=int(transcendentals),
                           bytes_accessed=int(bytes_accessed))

    out2d = pl.pallas_call(
        _make_kernel(T),
        out_shape=jax.ShapeDtypeStruct((M, LANE), jnp.float32),
        grid_spec=pltpu.PrefetchScalarGridSpec(
            num_scalar_prefetch=0,
            grid=(B,),                       # one batch element per step; megacore-shardable
            in_specs=in_specs,
            out_specs=out_spec,
        ),
        compiler_params=pltpu.CompilerParams(dimension_semantics=("parallel",)),
        cost_estimate=cost,
    )(x_pad, *weights)

    return out2d[:, :OUTPUT_DIM].reshape(B, T, OUTPUT_DIM)


def init_params(key):
    """Deterministic synthetic parameters matching the PyTorch module's shapes."""
    ks = jax.random.split(key, 12)

    def dense(k, shape, scale=0.08):
        return (scale * jax.random.normal(k, shape)).astype(jnp.float32)

    L, E, F3 = NUM_LAYERS, EMBED, 3 * EMBED
    params = {
        # input_proj: Linear(INPUT_DIM, EMBED)
        "w_in": dense(ks[0], (E, INPUT_DIM)),
        "b_in": dense(ks[1], (E,)),
        # per-layer MultiheadAttention
        "in_proj_w": dense(ks[2], (L, F3, E)),
        "in_proj_b": dense(ks[3], (L, F3)),
        "out_proj_w": dense(ks[4], (L, E, E)),
        "out_proj_b": dense(ks[5], (L, E)),
        # LayerNorms (PyTorch default init: ones / zeros)
        "ln1_w": jnp.ones((L, E), jnp.float32),
        "ln1_b": jnp.zeros((L, E), jnp.float32),
        "ln2_w": jnp.ones((L, E), jnp.float32),
        "ln2_b": jnp.zeros((L, E), jnp.float32),
        # feed-forward
        "lin1_w": dense(ks[6], (L, FF_DIM, E)),
        "lin1_b": dense(ks[7], (L, FF_DIM)),
        "lin2_w": dense(ks[8], (L, E, FF_DIM)),
        "lin2_b": dense(ks[9], (L, E)),
        # output_proj: Linear(EMBED, OUTPUT_DIM)
        "w_out": dense(ks[10], (OUTPUT_DIM, E)),
        "b_out": dense(ks[11], (OUTPUT_DIM,)),
    }
    # Sinusoidal positional encoding table, as in PositionalEncoding(d_model, max_len=1000)
    max_len = 1000
    pos = jnp.arange(max_len, dtype=jnp.float32)[:, None]
    div = jnp.exp(jnp.arange(0, EMBED, 2, dtype=jnp.float32) * (-math.log(10000.0) / EMBED))
    pe = jnp.zeros((max_len, EMBED), jnp.float32)
    pe = pe.at[:, 0::2].set(jnp.sin(pos * div))
    pe = pe.at[:, 1::2].set(jnp.cos(pos * div))
    params["pe"] = pe
    return params


def reference_forward(meow, params):
    """Plain-JAX reference of the same forward pass (for numerical check)."""
    T = meow.shape[1]
    pe = params["pe"][:T]

    def one(x):
        h = x @ params["w_in"].T + params["b_in"]
        h = h + pe
        for l in range(NUM_LAYERS):
            qkv = h @ params["in_proj_w"][l].T + params["in_proj_b"][l]
            q, k, v = qkv[:, :EMBED], qkv[:, EMBED:2 * EMBED], qkv[:, 2 * EMBED:]
            heads = []
            for hh in range(NHEAD):
                s0 = hh * HEAD_DIM
                qh = q[:, s0:s0 + HEAD_DIM] / math.sqrt(HEAD_DIM)
                sc = qh @ k[:, s0:s0 + HEAD_DIM].T
                p = jax.nn.softmax(sc, axis=-1)
                heads.append(p @ v[:, s0:s0 + HEAD_DIM])
            attn = jnp.concatenate(heads, -1) @ params["out_proj_w"][l].T + params["out_proj_b"][l]
            h = _layer_norm(h + attn, params["ln1_w"][l], params["ln1_b"][l])
            ff = jnp.maximum(h @ params["lin1_w"][l].T + params["lin1_b"][l], 0.0)
            ff = ff @ params["lin2_w"][l].T + params["lin2_b"][l]
            h = _layer_norm(h + ff, params["ln2_w"][l], params["ln2_b"][l])
        return h @ params["w_out"].T + params["b_out"]

    return jax.vmap(one)(meow)


if __name__ == "__main__":
    key = jax.random.PRNGKey(0)
    pkey, xkey = jax.random.split(key)
    params = init_params(pkey)

    B, T = 2, 8
    meow_feats = jax.random.normal(xkey, (B, T, INPUT_DIM), jnp.float32)

    out = jax.block_until_ready(vocalnet_forward(meow_feats, params))

    with jax.default_matmul_precision("highest"):
        ref = jax.block_until_ready(reference_forward(meow_feats, params))

    assert out.shape == (B, T, OUTPUT_DIM), out.shape
    assert bool(jnp.all(jnp.isfinite(out)))
    max_err = float(jnp.max(jnp.abs(out - ref)))
    assert max_err < 2e-2, f"max abs err vs reference: {max_err}"

    print("KERNEL_OK")
</pallas_src>

<mosaic_0001>
module attributes {stable_mosaic.version = 11 : i64} {
  func.func @kernel(%arg0: i32, %arg1: memref<8x128xf32, #tpu.memory_space<vmem>>, %arg2: memref<8x32xf32, #tpu.memory_space<vmem>>, %arg3: memref<128x32xf32, #tpu.memory_space<vmem>>, %arg4: memref<2x32x96xf32, #tpu.memory_space<vmem>>, %arg5: memref<2x32x32xf32, #tpu.memory_space<vmem>>, %arg6: memref<2x32x64xf32, #tpu.memory_space<vmem>>, %arg7: memref<2x64x32xf32, #tpu.memory_space<vmem>>, %arg8: memref<32x128xf32, #tpu.memory_space<vmem>>, %arg9: memref<24x128xf32, #tpu.memory_space<vmem>>, %arg10: memref<8x128xf32, #tpu.memory_space<vmem>>) attributes {dimension_semantics = [#tpu.dimension_semantics<parallel>], iteration_bounds = array<i64: 2>, scalar_prefetch = 0 : i64, scratch_operands = 0 : i64, tpu.core_type = #tpu.core_type<tc>, window_params = [{transform_indices = @transform_0, window_bounds = array<i64: 8, 128>}, {pipeline_mode = #tpu.pipeline_mode<synchronous>, transform_indices = @transform_1, window_bounds = array<i64: 8, 32>}, {pipeline_mode = #tpu.pipeline_mode<synchronous>, transform_indices = @transform_2, window_bounds = array<i64: 128, 32>}, {pipeline_mode = #tpu.pipeline_mode<synchronous>, transform_indices = @transform_3, window_bounds = array<i64: 2, 32, 96>}, {pipeline_mode = #tpu.pipeline_mode<synchronous>, transform_indices = @transform_4, window_bounds = array<i64: 2, 32, 32>}, {pipeline_mode = #tpu.pipeline_mode<synchronous>, transform_indices = @transform_5, window_bounds = array<i64: 2, 32, 64>}, {pipeline_mode = #tpu.pipeline_mode<synchronous>, transform_indices = @transform_6, window_bounds = array<i64: 2, 64, 32>}, {pipeline_mode = #tpu.pipeline_mode<synchronous>, transform_indices = @transform_7, window_bounds = array<i64: 32, 128>}, {pipeline_mode = #tpu.pipeline_mode<synchronous>, transform_indices = @transform_8, window_bounds = array<i64: 24, 128>}, {transform_indices = @transform_9, window_bounds = array<i64: 8, 128>}]} {
    %c0 = arith.constant 0 : index
    %c0_0 = arith.constant 0 : index
    %0 = vector.load %arg1[%c0, %c0_0] : memref<8x128xf32, #tpu.memory_space<vmem>>, vector<8x128xf32>
    %c0_1 = arith.constant 0 : index
    %c0_2 = arith.constant 0 : index
    %1 = vector.load %arg3[%c0_1, %c0_2] : memref<128x32xf32, #tpu.memory_space<vmem>>, vector<128x32xf32>
    %cst = arith.constant dense<0.000000e+00> : vector<8x32xf32>
    %2 = tpu.matmul %0, %1, %cst {dimension_numbers = #tpu.dot_dimension_numbers<[1], [0], [0], [1], [0, 0, 1, 1], [], []>} : vector<8x128xf32>, vector<128x32xf32>, vector<8x32xf32> -> vector<8x32xf32>
    %c0_3 = arith.constant 0 : index
    %c0_4 = arith.constant 0 : index
    %3 = vector.load %arg9[%c0_3, %c0_4] : memref<24x128xf32, #tpu.memory_space<vmem>>, vector<1x32xf32>
    %4 = vector.broadcast %3 : vector<1x32xf32> to vector<8x32xf32>
    %5 = arith.addf %2, %4 : vector<8x32xf32>
    %c0_5 = arith.constant 0 : index
    %c0_6 = arith.constant 0 : index
    %6 = vector.load %arg2[%c0_5, %c0_6] : memref<8x32xf32, #tpu.memory_space<vmem>>, vector<8x32xf32>
    %7 = arith.addf %5, %6 : vector<8x32xf32>
    %c0_7 = arith.constant 0 : index
    %c0_8 = arith.constant 0 : index
    %c0_9 = arith.constant 0 : index
    %8 = vector.load %arg4[%c0_7, %c0_8, %c0_9] : memref<2x32x96xf32, #tpu.memory_space<vmem>>, vector<1x32x96xf32>
    %9 = vector.shape_cast %8 : vector<1x32x96xf32> to vector<32x96xf32>
    %cst_10 = arith.constant dense<0.000000e+00> : vector<8x96xf32>
    %10 = tpu.matmul %7, %9, %cst_10 {dimension_numbers = #tpu.dot_dimension_numbers<[1], [0], [0], [1], [0, 0, 1, 1], [], []>} : vector<8x32xf32>, vector<32x96xf32>, vector<8x96xf32> -> vector<8x96xf32>
    %c1 = arith.constant 1 : index
    %c0_11 = arith.constant 0 : index
    %11 = vector.load %arg9[%c1, %c0_11] : memref<24x128xf32, #tpu.memory_space<vmem>>, vector<1x96xf32>
    %12 = vector.broadcast %11 : vector<1x96xf32> to vector<8x96xf32>
    %13 = arith.addf %10, %12 : vector<8x96xf32>
    %14 = vector.extract_strided_slice %13 {offsets = [0, 0], sizes = [8, 32], strides = [1, 1]} : vector<8x96xf32> to vector<8x32xf32>
    %15 = vector.shape_cast %14 : vector<8x32xf32> to vector<8x4x8xf32>
    %16 = tpu.transpose %15, [1, 0, 2] : vector<8x4x8xf32> -> vector<4x8x8xf32>
    %17 = vector.extract_strided_slice %13 {offsets = [0, 32], sizes = [8, 32], strides = [1, 1]} : vector<8x96xf32> to vector<8x32xf32>
    %18 = vector.shape_cast %17 : vector<8x32xf32> to vector<8x4x8xf32>
    %19 = tpu.transpose %18, [1, 0, 2] : vector<8x4x8xf32> -> vector<4x8x8xf32>
    %20 = vector.extract_strided_slice %13 {offsets = [0, 64], sizes = [8, 32], strides = [1, 1]} : vector<8x96xf32> to vector<8x32xf32>
    %21 = vector.shape_cast %20 : vector<8x32xf32> to vector<8x4x8xf32>
    %22 = tpu.transpose %21, [1, 0, 2] : vector<8x4x8xf32> -> vector<4x8x8xf32>
    "tpu.trace_start"() <{level = 10 : i32, message = "htd,hsd->hts"}> : () -> ()
    %cst_12 = arith.constant dense<0.000000e+00> : vector<4x8x8xf32>
    %23 = tpu.matmul %16, %19, %cst_12 {dimension_numbers = #tpu.dot_dimension_numbers<[2], [2], [1], [1], [0, 0, 0, 1, 1, 1], [0], [0]>} : vector<4x8x8xf32>, vector<4x8x8xf32>, vector<4x8x8xf32> -> vector<4x8x8xf32>
    "tpu.trace_stop"() : () -> ()
    %cst_13 = arith.constant dense<0xFF800000> : vector<4x8xf32>
    %24 = vector.multi_reduction <maximumf>, %23, %cst_13 [2] : vector<4x8x8xf32> to vector<4x8xf32>
    %25 = vector.shape_cast %24 : vector<4x8xf32> to vector<4x8x1xf32>
    %26 = vector.broadcast %25 : vector<4x8x1xf32> to vector<4x8x8xf32>
    %27 = arith.subf %23, %26 : vector<4x8x8xf32>
    %28 = math.exp %27 : vector<4x8x8xf32>
    %cst_14 = arith.constant dense<0.000000e+00> : vector<4x8xf32>
    %29 = vector.multi_reduction <add>, %28, %cst_14 [2] : vector<4x8x8xf32> to vector<4x8xf32>
    %30 = vector.shape_cast %29 : vector<4x8xf32> to vector<4x8x1xf32>
    %31 = tpu.reciprocal %30 {approx = true} : vector<4x8x1xf32> -> vector<4x8x1xf32>
    %32 = vector.broadcast %31 : vector<4x8x1xf32> to vector<4x8x8xf32>
    %33 = arith.mulf %28, %32 : vector<4x8x8xf32>
    "tpu.trace_start"() <{level = 10 : i32, message = "hts,hsd->htd"}> : () -> ()
    %cst_15 = arith.constant dense<0.000000e+00> : vector<4x8x8xf32>
    %34 = tpu.matmul %33, %22, %cst_15 {dimension_numbers = #tpu.dot_dimension_numbers<[2], [1], [1], [2], [0, 0, 0, 1, 1, 2], [0], [0]>} : vector<4x8x8xf32>, vector<4x8x8xf32>, vector<4x8x8xf32> -> vector<4x8x8xf32>
    "tpu.trace_stop"() : () -> ()
    %35 = tpu.transpose %34, [1, 0, 2] : vector<4x8x8xf32> -> vector<8x4x8xf32>
    %36 = vector.shape_cast %35 : vector<8x4x8xf32> to vector<8x32xf32>
    %c0_16 = arith.constant 0 : index
    %c0_17 = arith.constant 0 : index
    %c0_18 = arith.constant 0 : index
    %37 = vector.load %arg5[%c0_16, %c0_17, %c0_18] : memref<2x32x32xf32, #tpu.memory_space<vmem>>, vector<1x32x32xf32>
    %38 = vector.shape_cast %37 : vector<1x32x32xf32> to vector<32x32xf32>
    %cst_19 = arith.constant dense<0.000000e+00> : vector<8x32xf32>
    %39 = tpu.matmul %36, %38, %cst_19 {dimension_numbers = #tpu.dot_dimension_numbers<[1], [0], [0], [1], [0, 0, 1, 1], [], []>} : vector<8x32xf32>, vector<32x32xf32>, vector<8x32xf32> -> vector<8x32xf32>
    %c2 = arith.constant 2 : index
    %c0_20 = arith.constant 0 : index
    %40 = vector.load %arg9[%c2, %c0_20] : memref<24x128xf32, #tpu.memory_space<vmem>>, vector<1x32xf32>
    %41 = vector.broadcast %40 : vector<1x32xf32> to vector<8x32xf32>
    %42 = arith.addf %39, %41 : vector<8x32xf32>
    %43 = arith.addf %7, %42 : vector<8x32xf32>
    %c3 = arith.constant 3 : index
    %c0_21 = arith.constant 0 : index
    %44 = vector.load %arg9[%c3, %c0_21] : memref<24x128xf32, #tpu.memory_space<vmem>>, vector<1x32xf32>
    %c4 = arith.constant 4 : index
    %c0_22 = arith.constant 0 : index
    %45 = vector.load %arg9[%c4, %c0_22] : memref<24x128xf32, #tpu.memory_space<vmem>>, vector<1x32xf32>
    %cst_23 = arith.constant dense<0.000000e+00> : vector<8xf32>
    %46 = vector.multi_reduction <add>, %43, %cst_23 [1] : vector<8x32xf32> to vector<8xf32>
    %47 = vector.shape_cast %46 : vector<8xf32> to vector<8x1xf32>
    %cst_24 = arith.constant 3.200000e+01 : f32
    %48 = vector.broadcast %cst_24 : f32 to vector<8x1xf32>
    %49 = arith.divf %47, %48 : vector<8x1xf32>
    %50 = vector.broadcast %49 : vector<8x1xf32> to vector<8x32xf32>
    %51 = arith.subf %43, %50 : vector<8x32xf32>
    %52 = arith.mulf %51, %51 : vector<8x32xf32>
    %cst_25 = arith.constant dense<0.000000e+00> : vector<8xf32>
    %53 = vector.multi_reduction <add>, %52, %cst_25 [1] : vector<8x32xf32> to vector<8xf32>
    %54 = vector.shape_cast %53 : vector<8xf32> to vector<8x1xf32>
    %cst_26 = arith.constant 3.200000e+01 : f32
    %55 = vector.broadcast %cst_26 : f32 to vector<8x1xf32>
    %56 = arith.divf %54, %55 : vector<8x1xf32>
    %57 = vector.broadcast %49 : vector<8x1xf32> to vector<8x32xf32>
    %58 = arith.subf %43, %57 : vector<8x32xf32>
    %cst_27 = arith.constant 9.99999974E-6 : f32
    %59 = vector.broadcast %cst_27 : f32 to vector<8x1xf32>
    %60 = arith.addf %56, %59 : vector<8x1xf32>
    %61 = math.rsqrt %60 : vector<8x1xf32>
    %62 = vector.broadcast %61 : vector<8x1xf32> to vector<8x32xf32>
    %63 = arith.mulf %58, %62 : vector<8x32xf32>
    %64 = vector.broadcast %44 : vector<1x32xf32> to vector<8x32xf32>
    %65 = arith.mulf %63, %64 : vector<8x32xf32>
    %66 = vector.broadcast %45 : vector<1x32xf32> to vector<8x32xf32>
    %67 = arith.addf %65, %66 : vector<8x32xf32>
    %c0_28 = arith.constant 0 : index
    %c0_29 = arith.constant 0 : index
    %c0_30 = arith.constant 0 : index
    %68 = vector.load %arg6[%c0_28, %c0_29, %c0_30] : memref<2x32x64xf32, #tpu.memory_space<vmem>>, vector<1x32x64xf32>
    %69 = vector.shape_cast %68 : vector<1x32x64xf32> to vector<32x64xf32>
    %cst_31 = arith.constant dense<0.000000e+00> : vector<8x64xf32>
    %70 = tpu.matmul %67, %69, %cst_31 {dimension_numbers = #tpu.dot_dimension_numbers<[1], [0], [0], [1], [0, 0, 1, 1], [], []>} : vector<8x32xf32>, vector<32x64xf32>, vector<8x64xf32> -> vector<8x64xf32>
    %c5 = arith.constant 5 : index
    %c0_32 = arith.constant 0 : index
    %71 = vector.load %arg9[%c5, %c0_32] : memref<24x128xf32, #tpu.memory_space<vmem>>, vector<1x64xf32>
    %72 = vector.broadcast %71 : vector<1x64xf32> to vector<8x64xf32>
    %73 = arith.addf %70, %72 : vector<8x64xf32>
    %cst_33 = arith.constant 0.000000e+00 : f32
    %74 = vector.broadcast %cst_33 : f32 to vector<8x64xf32>
    %75 = arith.maximumf %73, %74 : vector<8x64xf32>
    %c0_34 = arith.constant 0 : index
    %c0_35 = arith.constant 0 : index
    %c0_36 = arith.constant 0 : index
    %76 = vector.load %arg7[%c0_34, %c0_35, %c0_36] : memref<2x64x32xf32, #tpu.memory_space<vmem>>, vector<1x64x32xf32>
    %77 = vector.shape_cast %76 : vector<1x64x32xf32> to vector<64x32xf32>
    %cst_37 = arith.constant dense<0.000000e+00> : vector<8x32xf32>
    %78 = tpu.matmul %75, %77, %cst_37 {dimension_numbers = #tpu.dot_dimension_numbers<[1], [0], [0], [1], [0, 0, 1, 1], [], []>} : vector<8x64xf32>, vector<64x32xf32>, vector<8x32xf32> -> vector<8x32xf32>
    %c6 = arith.constant 6 : index
    %c0_38 = arith.constant 0 : index
    %79 = vector.load %arg9[%c6, %c0_38] : memref<24x128xf32, #tpu.memory_space<vmem>>, vector<1x32xf32>
    %80 = vector.broadcast %79 : vector<1x32xf32> to vector<8x32xf32>
    %81 = arith.addf %78, %80 : vector<8x32xf32>
    %82 = arith.addf %67, %81 : vector<8x32xf32>
    %c7 = arith.constant 7 : index
    %c0_39 = arith.constant 0 : index
    %83 = vector.load %arg9[%c7, %c0_39] : memref<24x128xf32, #tpu.memory_space<vmem>>, vector<1x32xf32>
    %c8 = arith.constant 8 : index
    %c0_40 = arith.constant 0 : index
    %84 = vector.load %arg9[%c8, %c0_40] : memref<24x128xf32, #tpu.memory_space<vmem>>, vector<1x32xf32>
    %cst_41 = arith.constant dense<0.000000e+00> : vector<8xf32>
    %85 = vector.multi_reduction <add>, %82, %cst_41 [1] : vector<8x32xf32> to vector<8xf32>
    %86 = vector.shape_cast %85 : vector<8xf32> to vector<8x1xf32>
    %cst_42 = arith.constant 3.200000e+01 : f32
    %87 = vector.broadcast %cst_42 : f32 to vector<8x1xf32>
    %88 = arith.divf %86, %87 : vector<8x1xf32>
    %89 = vector.broadcast %88 : vector<8x1xf32> to vector<8x32xf32>
    %90 = arith.subf %82, %89 : vector<8x32xf32>
    %91 = arith.mulf %90, %90 : vector<8x32xf32>
    %cst_43 = arith.constant dense<0.000000e+00> : vector<8xf32>
    %92 = vector.multi_reduction <add>, %91, %cst_43 [1] : vector<8x32xf32> to vector<8xf32>
    %93 = vector.shape_cast %92 : vector<8xf32> to vector<8x1xf32>
    %cst_44 = arith.constant 3.200000e+01 : f32
    %94 = vector.broadcast %cst_44 : f32 to vector<8x1xf32>
    %95 = arith.divf %93, %94 : vector<8x1xf32>
    %96 = vector.broadcast %88 : vector<8x1xf32> to vector<8x32xf32>
    %97 = arith.subf %82, %96 : vector<8x32xf32>
    %cst_45 = arith.constant 9.99999974E-6 : f32
    %98 = vector.broadcast %cst_45 : f32 to vector<8x1xf32>
    %99 = arith.addf %95, %98 : vector<8x1xf32>
    %100 = math.rsqrt %99 : vector<8x1xf32>
    %101 = vector.broadcast %100 : vector<8x1xf32> to vector<8x32xf32>
    %102 = arith.mulf %97, %101 : vector<8x32xf32>
    %103 = vector.broadcast %83 : vector<1x32xf32> to vector<8x32xf32>
    %104 = arith.mulf %102, %103 : vector<8x32xf32>
    %105 = vector.broadcast %84 : vector<1x32xf32> to vector<8x32xf32>
    %106 = arith.addf %104, %105 : vector<8x32xf32>
    %c1_46 = arith.constant 1 : index
    %c0_47 = arith.constant 0 : index
    %c0_48 = arith.constant 0 : index
    %107 = vector.load %arg4[%c1_46, %c0_47, %c0_48] : memref<2x32x96xf32, #tpu.memory_space<vmem>>, vector<1x32x96xf32>
    %108 = vector.shape_cast %107 : vector<1x32x96xf32> to vector<32x96xf32>
    %cst_49 = arith.constant dense<0.000000e+00> : vector<8x96xf32>
    %109 = tpu.matmul %106, %108, %cst_49 {dimension_numbers = #tpu.dot_dimension_numbers<[1], [0], [0], [1], [0, 0, 1, 1], [], []>} : vector<8x32xf32>, vector<32x96xf32>, vector<8x96xf32> -> vector<8x96xf32>
    %c9 = arith.constant 9 : index
    %c0_50 = arith.constant 0 : index
    %110 = vector.load %arg9[%c9, %c0_50] : memref<24x128xf32, #tpu.memory_space<vmem>>, vector<1x96xf32>
    %111 = vector.broadcast %110 : vector<1x96xf32> to vector<8x96xf32>
    %112 = arith.addf %109, %111 : vector<8x96xf32>
    %113 = vector.extract_strided_slice %112 {offsets = [0, 0], sizes = [8, 32], strides = [1, 1]} : vector<8x96xf32> to vector<8x32xf32>
    %114 = vector.shape_cast %113 : vector<8x32xf32> to vector<8x4x8xf32>
    %115 = tpu.transpose %114, [1, 0, 2] : vector<8x4x8xf32> -> vector<4x8x8xf32>
    %116 = vector.extract_strided_slice %112 {offsets = [0, 32], sizes = [8, 32], strides = [1, 1]} : vector<8x96xf32> to vector<8x32xf32>
    %117 = vector.shape_cast %116 : vector<8x32xf32> to vector<8x4x8xf32>
    %118 = tpu.transpose %117, [1, 0, 2] : vector<8x4x8xf32> -> vector<4x8x8xf32>
    %119 = vector.extract_strided_slice %112 {offsets = [0, 64], sizes = [8, 32], strides = [1, 1]} : vector<8x96xf32> to vector<8x32xf32>
    %120 = vector.shape_cast %119 : vector<8x32xf32> to vector<8x4x8xf32>
    %121 = tpu.transpose %120, [1, 0, 2] : vector<8x4x8xf32> -> vector<4x8x8xf32>
    "tpu.trace_start"() <{level = 10 : i32, message = "htd,hsd->hts"}> : () -> ()
    %cst_51 = arith.constant dense<0.000000e+00> : vector<4x8x8xf32>
    %122 = tpu.matmul %115, %118, %cst_51 {dimension_numbers = #tpu.dot_dimension_numbers<[2], [2], [1], [1], [0, 0, 0, 1, 1, 1], [0], [0]>} : vector<4x8x8xf32>, vector<4x8x8xf32>, vector<4x8x8xf32> -> vector<4x8x8xf32>
    "tpu.trace_stop"() : () -> ()
    %cst_52 = arith.constant dense<0xFF800000> : vector<4x8xf32>
    %123 = vector.multi_reduction <maximumf>, %122, %cst_52 [2] : vector<4x8x8xf32> to vector<4x8xf32>
    %124 = vector.shape_cast %123 : vector<4x8xf32> to vector<4x8x1xf32>
    %125 = vector.broadcast %124 : vector<4x8x1xf32> to vector<4x8x8xf32>
    %126 = arith.subf %122, %125 : vector<4x8x8xf32>
    %127 = math.exp %126 : vector<4x8x8xf32>
    %cst_53 = arith.constant dense<0.000000e+00> : vector<4x8xf32>
    %128 = vector.multi_reduction <add>, %127, %cst_53 [2] : vector<4x8x8xf32> to vector<4x8xf32>
    %129 = vector.shape_cast %128 : vector<4x8xf32> to vector<4x8x1xf32>
    %130 = tpu.reciprocal %129 {approx = true} : vector<4x8x1xf32> -> vector<4x8x1xf32>
    %131 = vector.broadcast %130 : vector<4x8x1xf32> to vector<4x8x8xf32>
    %132 = arith.mulf %127, %131 : vector<4x8x8xf32>
    "tpu.trace_start"() <{level = 10 : i32, message = "hts,hsd->htd"}> : () -> ()
    %cst_54 = arith.constant dense<0.000000e+00> : vector<4x8x8xf32>
    %133 = tpu.matmul %132, %121, %cst_54 {dimension_numbers = #tpu.dot_dimension_numbers<[2], [1], [1], [2], [0, 0, 0, 1, 1, 2], [0], [0]>} : vector<4x8x8xf32>, vector<4x8x8xf32>, vector<4x8x8xf32> -> vector<4x8x8xf32>
    "tpu.trace_stop"() : () -> ()
    %134 = tpu.transpose %133, [1, 0, 2] : vector<4x8x8xf32> -> vector<8x4x8xf32>
    %135 = vector.shape_cast %134 : vector<8x4x8xf32> to vector<8x32xf32>
    %c1_55 = arith.constant 1 : index
    %c0_56 = arith.constant 0 : index
    %c0_57 = arith.constant 0 : index
    %136 = vector.load %arg5[%c1_55, %c0_56, %c0_57] : memref<2x32x32xf32, #tpu.memory_space<vmem>>, vector<1x32x32xf32>
    %137 = vector.shape_cast %136 : vector<1x32x32xf32> to vector<32x32xf32>
    %cst_58 = arith.constant dense<0.000000e+00> : vector<8x32xf32>
    %138 = tpu.matmul %135, %137, %cst_58 {dimension_numbers = #tpu.dot_dimension_numbers<[1], [0], [0], [1], [0, 0, 1, 1], [], []>} : vector<8x32xf32>, vector<32x32xf32>, vector<8x32xf32> -> vector<8x32xf32>
    %c10 = arith.constant 10 : index
    %c0_59 = arith.constant 0 : index
    %139 = vector.load %arg9[%c10, %c0_59] : memref<24x128xf32, #tpu.memory_space<vmem>>, vector<1x32xf32>
    %140 = vector.broadcast %139 : vector<1x32xf32> to vector<8x32xf32>
    %141 = arith.addf %138, %140 : vector<8x32xf32>
    %142 = arith.addf %106, %141 : vector<8x32xf32>
    %c11 = arith.constant 11 : index
    %c0_60 = arith.constant 0 : index
    %143 = vector.load %arg9[%c11, %c0_60] : memref<24x128xf32, #tpu.memory_space<vmem>>, vector<1x32xf32>
    %c12 = arith.constant 12 : index
    %c0_61 = arith.constant 0 : index
    %144 = vector.load %arg9[%c12, %c0_61] : memref<24x128xf32, #tpu.memory_space<vmem>>, vector<1x32xf32>
    %cst_62 = arith.constant dense<0.000000e+00> : vector<8xf32>
    %145 = vector.multi_reduction <add>, %142, %cst_62 [1] : vector<8x32xf32> to vector<8xf32>
    %146 = vector.shape_cast %145 : vector<8xf32> to vector<8x1xf32>
    %cst_63 = arith.constant 3.200000e+01 : f32
    %147 = vector.broadcast %cst_63 : f32 to vector<8x1xf32>
    %148 = arith.divf %146, %147 : vector<8x1xf32>
    %149 = vector.broadcast %148 : vector<8x1xf32> to vector<8x32xf32>
    %150 = arith.subf %142, %149 : vector<8x32xf32>
    %151 = arith.mulf %150, %150 : vector<8x32xf32>
    %cst_64 = arith.constant dense<0.000000e+00> : vector<8xf32>
    %152 = vector.multi_reduction <add>, %151, %cst_64 [1] : vector<8x32xf32> to vector<8xf32>
    %153 = vector.shape_cast %152 : vector<8xf32> to vector<8x1xf32>
    %cst_65 = arith.constant 3.200000e+01 : f32
    %154 = vector.broadcast %cst_65 : f32 to vector<8x1xf32>
    %155 = arith.divf %153, %154 : vector<8x1xf32>
    %156 = vector.broadcast %148 : vector<8x1xf32> to vector<8x32xf32>
    %157 = arith.subf %142, %156 : vector<8x32xf32>
    %cst_66 = arith.constant 9.99999974E-6 : f32
    %158 = vector.broadcast %cst_66 : f32 to vector<8x1xf32>
    %159 = arith.addf %155, %158 : vector<8x1xf32>
    %160 = math.rsqrt %159 : vector<8x1xf32>
    %161 = vector.broadcast %160 : vector<8x1xf32> to vector<8x32xf32>
    %162 = arith.mulf %157, %161 : vector<8x32xf32>
    %163 = vector.broadcast %143 : vector<1x32xf32> to vector<8x32xf32>
    %164 = arith.mulf %162, %163 : vector<8x32xf32>
    %165 = vector.broadcast %144 : vector<1x32xf32> to vector<8x32xf32>
    %166 = arith.addf %164, %165 : vector<8x32xf32>
    %c1_67 = arith.constant 1 : index
    %c0_68 = arith.constant 0 : index
    %c0_69 = arith.constant 0 : index
    %167 = vector.load %arg6[%c1_67, %c0_68, %c0_69] : memref<2x32x64xf32, #tpu.memory_space<vmem>>, vector<1x32x64xf32>
    %168 = vector.shape_cast %167 : vector<1x32x64xf32> to vector<32x64xf32>
    %cst_70 = arith.constant dense<0.000000e+00> : vector<8x64xf32>
    %169 = tpu.matmul %166, %168, %cst_70 {dimension_numbers = #tpu.dot_dimension_numbers<[1], [0], [0], [1], [0, 0, 1, 1], [], []>} : vector<8x32xf32>, vector<32x64xf32>, vector<8x64xf32> -> vector<8x64xf32>
    %c13 = arith.constant 13 : index
    %c0_71 = arith.constant 0 : index
    %170 = vector.load %arg9[%c13, %c0_71] : memref<24x128xf32, #tpu.memory_space<vmem>>, vector<1x64xf32>
    %171 = vector.broadcast %170 : vector<1x64xf32> to vector<8x64xf32>
    %172 = arith.addf %169, %171 : vector<8x64xf32>
    %cst_72 = arith.constant 0.000000e+00 : f32
    %173 = vector.broadcast %cst_72 : f32 to vector<8x64xf32>
    %174 = arith.maximumf %172, %173 : vector<8x64xf32>
    %c1_73 = arith.constant 1 : index
    %c0_74 = arith.constant 0 : index
    %c0_75 = arith.constant 0 : index
    %175 = vector.load %arg7[%c1_73, %c0_74, %c0_75] : memref<2x64x32xf32, #tpu.memory_space<vmem>>, vector<1x64x32xf32>
    %176 = vector.shape_cast %175 : vector<1x64x32xf32> to vector<64x32xf32>
    %cst_76 = arith.constant dense<0.000000e+00> : vector<8x32xf32>
    %177 = tpu.matmul %174, %176, %cst_76 {dimension_numbers = #tpu.dot_dimension_numbers<[1], [0], [0], [1], [0, 0, 1, 1], [], []>} : vector<8x64xf32>, vector<64x32xf32>, vector<8x32xf32> -> vector<8x32xf32>
    %c14 = arith.constant 14 : index
    %c0_77 = arith.constant 0 : index
    %178 = vector.load %arg9[%c14, %c0_77] : memref<24x128xf32, #tpu.memory_space<vmem>>, vector<1x32xf32>
    %179 = vector.broadcast %178 : vector<1x32xf32> to vector<8x32xf32>
    %180 = arith.addf %177, %179 : vector<8x32xf32>
    %181 = arith.addf %166, %180 : vector<8x32xf32>
    %c15 = arith.constant 15 : index
    %c0_78 = arith.constant 0 : index
    %182 = vector.load %arg9[%c15, %c0_78] : memref<24x128xf32, #tpu.memory_space<vmem>>, vector<1x32xf32>
    %c16 = arith.constant 16 : index
    %c0_79 = arith.constant 0 : index
    %183 = vector.load %arg9[%c16, %c0_79] : memref<24x128xf32, #tpu.memory_space<vmem>>, vector<1x32xf32>
    %cst_80 = arith.constant dense<0.000000e+00> : vector<8xf32>
    %184 = vector.multi_reduction <add>, %181, %cst_80 [1] : vector<8x32xf32> to vector<8xf32>
    %185 = vector.shape_cast %184 : vector<8xf32> to vector<8x1xf32>
    %cst_81 = arith.constant 3.200000e+01 : f32
    %186 = vector.broadcast %cst_81 : f32 to vector<8x1xf32>
    %187 = arith.divf %185, %186 : vector<8x1xf32>
    %188 = vector.broadcast %187 : vector<8x1xf32> to vector<8x32xf32>
    %189 = arith.subf %181, %188 : vector<8x32xf32>
    %190 = arith.mulf %189, %189 : vector<8x32xf32>
    %cst_82 = arith.constant dense<0.000000e+00> : vector<8xf32>
    %191 = vector.multi_reduction <add>, %190, %cst_82 [1] : vector<8x32xf32> to vector<8xf32>
    %192 = vector.shape_cast %191 : vector<8xf32> to vector<8x1xf32>
    %cst_83 = arith.constant 3.200000e+01 : f32
    %193 = vector.broadcast %cst_83 : f32 to vector<8x1xf32>
    %194 = arith.divf %192, %193 : vector<8x1xf32>
    %195 = vector.broadcast %187 : vector<8x1xf32> to vector<8x32xf32>
    %196 = arith.subf %181, %195 : vector<8x32xf32>
    %cst_84 = arith.constant 9.99999974E-6 : f32
    %197 = vector.broadcast %cst_84 : f32 to vector<8x1xf32>
    %198 = arith.addf %194, %197 : vector<8x1xf32>
    %199 = math.rsqrt %198 : vector<8x1xf32>
    %200 = vector.broadcast %199 : vector<8x1xf32> to vector<8x32xf32>
    %201 = arith.mulf %196, %200 : vector<8x32xf32>
    %202 = vector.broadcast %182 : vector<1x32xf32> to vector<8x32xf32>
    %203 = arith.mulf %201, %202 : vector<8x32xf32>
    %204 = vector.broadcast %183 : vector<1x32xf32> to vector<8x32xf32>
    %205 = arith.addf %203, %204 : vector<8x32xf32>
    %c0_85 = arith.constant 0 : index
    %c0_86 = arith.constant 0 : index
    %206 = vector.load %arg8[%c0_85, %c0_86] : memref<32x128xf32, #tpu.memory_space<vmem>>, vector<32x128xf32>
    %cst_87 = arith.constant dense<0.000000e+00> : vector<8x128xf32>
    %207 = tpu.matmul %205, %206, %cst_87 {dimension_numbers = #tpu.dot_dimension_numbers<[1], [0], [0], [1], [0, 0, 1, 1], [], []>} : vector<8x32xf32>, vector<32x128xf32>, vector<8x128xf32> -> vector<8x128xf32>
    %c17 = arith.constant 17 : index
    %c0_88 = arith.constant 0 : index
    %208 = vector.load %arg9[%c17, %c0_88] : memref<24x128xf32, #tpu.memory_space<vmem>>, vector<1x128xf32>
    %209 = vector.broadcast %208 : vector<1x128xf32> to vector<8x128xf32>
    %210 = arith.addf %207, %209 : vector<8x128xf32>
    %c0_89 = arith.constant 0 : index
    %c0_90 = arith.constant 0 : index
    %211 = vector.load %arg10[%c0_89, %c0_90] : memref<8x128xf32, #tpu.memory_space<vmem>>, vector<8x128xf32>
    tpu.vector_store %arg10[%c0_89, %c0_90], %210 {strides = array<i32>} : memref<8x128xf32, #tpu.memory_space<vmem>>, vector<8x128xf32>,
    return
  }
  func.func @transform_0(%arg0: i32) -> (i32, i32) {
    %c0_i32 = arith.constant 0 : i32
    %c0_i32_0 = arith.constant 0 : i32
    return %arg0, %c0_i32 : i32, i32
  }
  func.func @transform_1(%arg0: i32) -> (i32, i32) {
    %c0_i32 = arith.constant 0 : i32
    %c0_i32_0 = arith.constant 0 : i32
    %c0_i32_1 = arith.constant 0 : i32
    return %c0_i32, %c0_i32_0 : i32, i32
  }
  func.func @transform_2(%arg0: i32) -> (i32, i32) {
    %c0_i32 = arith.constant 0 : i32
    %c0_i32_0 = arith.constant 0 : i32
    %c0_i32_1 = arith.constant 0 : i32
    return %c0_i32, %c0_i32_0 : i32, i32
  }
  func.func @transform_3(%arg0: i32) -> (i32, i32, i32) {
    %c0_i32 = arith.constant 0 : i32
    %c0_i32_0 = arith.constant 0 : i32
    %c0_i32_1 = arith.constant 0 : i32
    %c0_i32_2 = arith.constant 0 : i32
    return %c0_i32, %c0_i32_0, %c0_i32_1 : i32, i32, i32
  }
  func.func @transform_4(%arg0: i32) -> (i32, i32, i32) {
    %c0_i32 = arith.constant 0 : i32
    %c0_i32_0 = arith.constant 0 : i32
    %c0_i32_1 = arith.constant 0 : i32
    %c0_i32_2 = arith.constant 0 : i32
    return %c0_i32, %c0_i32_0, %c0_i32_1 : i32, i32, i32
  }
  func.func @transform_5(%arg0: i32) -> (i32, i32, i32) {
    %c0_i32 = arith.constant 0 : i32
    %c0_i32_0 = arith.constant 0 : i32
    %c0_i32_1 = arith.constant 0 : i32
    %c0_i32_2 = arith.constant 0 : i32
    return %c0_i32, %c0_i32_0, %c0_i32_1 : i32, i32, i32
  }
  func.func @transform_6(%arg0: i32) -> (i32, i32, i32) {
    %c0_i32 = arith.constant 0 : i32
    %c0_i32_0 = arith.constant 0 : i32
    %c0_i32_1 = arith.constant 0 : i32
    %c0_i32_2 = arith.constant 0 : i32
    return %c0_i32, %c0_i32_0, %c0_i32_1 : i32, i32, i32
  }
  func.func @transform_7(%arg0: i32) -> (i32, i32) {
    %c0_i32 = arith.constant 0 : i32
    %c0_i32_0 = arith.constant 0 : i32
    %c0_i32_1 = arith.constant 0 : i32
    return %c0_i32, %c0_i32_0 : i32, i32
  }
  func.func @transform_8(%arg0: i32) -> (i32, i32) {
    %c0_i32 = arith.constant 0 : i32
    %c0_i32_0 = arith.constant 0 : i32
    %c0_i32_1 = arith.constant 0 : i32
    return %c0_i32, %c0_i32_0 : i32, i32
  }
  func.func @transform_9(%arg0: i32) -> (i32, i32) {
    %c0_i32 = arith.constant 0 : i32
    %c0_i32_0 = arith.constant 0 : i32
    return %arg0, %c0_i32 : i32, i32
  }
}

</mosaic_0001>

<bundles_post_ra>
// kernel: tpu_custom_call.1
= control target key start
LH: loop header
LB: loop body
LE: loop exit
PB: predicated region body
PF: predicated region fallthrough
CT: control target
= control target key end

     0   :  { %14 = vsyncpa [#allocation3], 0  ;;  %s5236_s0 = inlined_call_operand.vmem [shape: f32[16,128], index: 0, kind: input, shape index: {}]   ;;  %s5237_s1 = inlined_call_operand.vmem [shape: f32[8,32], index: 1, kind: input, shape index: {}]   ;;  %s5238_s2 = inlined_call_operand.vmem [shape: f32[128,32], index: 2, kind: input, shape index: {}]   ;;  %s5239_s3 = inlined_call_operand.vmem [shape: f32[2,32,96], index: 3, kind: input, shape index: {}]   ;;  %s5240_s4 = inlined_call_operand.vmem [shape: f32[2,32,32], index: 4, kind: input, shape index: {}]   ;;  %s5241_s5 = inlined_call_operand.vmem [shape: f32[2,32,64], index: 5, kind: input, shape index: {}]   ;;  %s5242_s6 = inlined_call_operand.vmem [shape: f32[2,64,32], index: 6, kind: input, shape index: {}]   ;;  %s5243_s7 = inlined_call_operand.vmem [shape: f32[32,128], index: 7, kind: input, shape index: {}]   ;;  %s5244_s8 = inlined_call_operand.vmem [shape: f32[24,128], index: 8, kind: input, shape index: {}]   ;;  %s5245_s9 = inlined_call_operand.hbm [shape: f32[16,128], index: 9, kind: output, shape index: {}]  }
   0x1   :  { %16 = vsyncpa [#allocation3 + $0x1], 0  ;;  %s4469_s30 = smov 0   ;;  %s4471_s10 = smov 0  }
   0x2   :  { %s4473_s11 = smov 0   ;;  %s4475_s12 = smov 0  }
   0x3 LB: > { %s4490_s13 = sadd.s32 4294967295, %s4404_s12   ;;  %s3824_s14 = sadd.s32 4294967294, %s4404_s12   ;;  %s4404_s12 = sphi %s4475_s12, %s5260_s12   ;;  %s4400_s11 = sphi %s4473_s11, %s5259_s11   ;;  %s4396_s10 = sphi %s4471_s10, %s5258_s10   ;;  %s4392_s30 = sphi %s4469_s30, %s5257_s30  }
   0x4   : > { %s4494_s15 = sadd.s32 1, %s4404_s12   ;;  %s223_s16 = sadd.s32 1, %s4400_s11 }
   0x5   : > { %s220_s17 = ssub.s32 %s4404_s12, %s4494_s15  ;;  %p233_p0 = scmp.ne.s32.totalorder %s4400_s11, %s4396_s10 }
   0x6   : > { %p221_p1 = scmp.eq.s32.totalorder %s220_s17, 0  ;;  %p234_p2 = scmp.eq.s32.totalorder %s4490_s13, 1 }
   0x7   : > { %p239_p3 = scmp.ne.s32.totalorder %s4396_s10, %s4392_s30  ;;  %p240_p4 = scmp.eq.s32.totalorder %s3824_s14, 1 }
   0x8   : > { %s4505_s18 = scalar_select %p221_p1, %s4400_s11, %s223_s16  }
   0x9   : > { %p4507_p5 = por %p234_p2, %p233_p0  ;;  %p4511_p6 = por %p240_p4, %p239_p3 }
   0xa   : > { %p3827_p7 = scmp.ge.s32.totalorder %s4404_s12, 1  ;;  %p289_p8 = scmp.lt.s32.totalorder %s4404_s12, 3 }
   0xc   : > { %p290_p9 = pnand %p3827_p7, %p289_p8 }
   0xd   : > { %p324_p10 = scmp.lt.s32.totalorder (!%p290_p9), %s4490_s13, 1  ;;  %s4408_s24 = smov (!%p290_p9), 104  }
   0xe   : > { %293 = sbr.rel (%p290_p9) target bundleno = 5524 (0x1594), region = 56  ;;  %s4409_s25 = smov (!%p290_p9), 120  }
   0xf   : > { %s4411_s27 = smov (!%p290_p9), 112   ;;  %s5249_s28 = smov (!%p290_p9), 64  }
  0x10   : > { %s5247_s14 = smov (!%p290_p9), 8   ;;  %s5248_s16 = smov (!%p290_p9), 16  }
  0x11   : > { %s5246_s17 = smov (!%p290_p9), 24  }
  0x13   : > { %v344_v0 = vld [vmem:[%s5238_s2 + $0x78] sm:$0xff]  ;;  %v4406_v1 = vmov 0.0   ;;  %v343_v2 = vld [vmem:[%s5238_s2 + $0x70] sm:$0xff]  ;;  %vm4407_vm0 = vmmov 0   ;;  %v342_v3 = vld [vmem:[%s5238_s2 + $0x68] sm:$0xff]  ;;  %s325_s21 = scalar_select %p324_p10, %s4490_s13, 1  ;;  %v520_v37 = vlaneseq }
  0x14   : > { %4023 = vmatprep.subr.mxu0 %v4406_v1  ;;  %4055 = vmatprep.mubr.msk.f32.mxu0 %vm4407_vm0, %v4406_v1  ;;  %v341_v4 = vld [vmem:[%s5238_s2 + $0x60] sm:$0xff]  ;;  %v425_v5 = vld [vmem:[%s5239_s3 + $0x18] sm:$0xff]  ;;  %v339_v7 = vld [vmem:[%s5238_s2 + $0x50] sm:$0xff]  ;;  %vm431_vm1 = vcmask 261120   ;;  %v4412_v35 = vmov 1983009808  }
  0x15   : > { %4024 = vmatpush3.msra.mxu0 %v344_v0  ;;  %4058 = vmatprep.subr.mxu1 %v4406_v1  ;;  %v340_v6 = vld [vmem:[%s5238_s2 + $0x58] sm:$0xff]  ;;  %v338_v8 = vld [vmem:[%s5238_s2 + $0x48] sm:$0xff]  ;;  %v337_v9 = vld [vmem:[%s5238_s2 + $0x40] sm:$0xff]  ;;  %s3829_s26 = sshll.u32 %s325_s21, 3  ;;  %v518_v36 = vunpack.c.l.s4 %v4412_v35  ;;  %v521_v39 = vshrl.u32 %v520_v37, 7  ;;  %vm947_vm2 = vcmask 64512  }
  0x16   : > { %4025 = vmatprep.subr.mxu0 %v4406_v1  ;;  %4066 = vmatprep.mubr.msk.f32.mxu1 %vm4407_vm0, %v4406_v1  ;;  %v336_v10 = vld [vmem:[%s5238_s2 + $0x38] sm:$0xff]  ;;  %v335_v11 = vld [vmem:[%s5238_s2 + $0x30] sm:$0xff]  ;;  %v334_v12 = vld [vmem:[%s5238_s2 + $0x28] sm:$0xff]  ;;  %s327_s22 = scalar_lea.vmem %s5236_s0, %s3829_s26  ;;  %s4410_s26 = smov 96   ;;  %v4413_v40 = vmov 1934713408  }
  0x17   : > { %4026 = vmatpush3.msra.mxu0 %v343_v2  ;;  %4059 = vmatpush3.msra.mxu1 %v425_v5  ;;  %v333_v13 = vld [vmem:[%s5238_s2 + $0x20] sm:$0xff]  ;;  %v332_v14 = vld [vmem:[%s5238_s2 + $0x18] sm:$0xff]  ;;  %v331_v15 = vld [vmem:[%s5238_s2 + $0x10] sm:$0xff]  ;;  %v519_v38 = vunpack.c.0.s8 %v518_v36  ;;  %v550_v41 = vunpack.c.l.s4 %v4413_v40  ;;  %vm1737_vm3 = vcmask 130048   ;;  %vm1739_vm4 = vcmask 195584   ;;  %s5254_s21 = smov 16  }
  0x18   : > { %4027 = vmatprep.subr.mxu0 %v4406_v1  ;;  %4060 = vmatprep.subr.mxu1 %v4406_v1  ;;  %v330_v16 = vld [vmem:[%s5238_s2 + $0x8] sm:$0xff]  ;;  %v329_v17 = vld [vmem:[%s5238_s2] sm:$0xff]  ;;  %v424_v19 = vld [vmem:[%s5239_s3 + $0x10] sm:$0xff]  ;;  %vm1946_vm5 = vcmask 523264  }
  0x19   : > { %4028 = vmatpush3.msra.mxu0 %v342_v3  ;;  %v328_v18 = vld [vmem:[%s327_s22] sm:$0xff]  ;;  %4061 = vmatpush3.msra.mxu1 %v424_v19  ;;  %v423_v20 = vld [vmem:[%s5239_s3 + $0x8] sm:$0xff]  ;;  %v4651_v44 = vsub.s32 %v519_v38, %v521_v39  ;;  %v551_v47 = vunpack.c.0.s8 %v550_v41 }
  0x1a   : > { %4029 = vmatprep.subr.mxu0 %v4406_v1  ;;  %4062 = vmatprep.subr.mxu1 %v4406_v1  ;;  %v422_v21 = vld [vmem:[%s5239_s3] sm:$0xff] }
  0x1b   : > { %4030 = vmatpush3.msra.mxu0 %v341_v4  ;;  %4063 = vmatpush3.msra.mxu1 %v423_v20  ;;  %v3830_v22 = vld [vmem:[%s5244_s8] ss:$0 sm:$0xff]  ;;  %v3831_v28 = vld [vmem:[%s5244_s8 + $0x1] ss:$0 sm:$0xff]  ;;  %v4661_v52 = vsub.s32 %v551_v47, %v521_v39 }
  0x1c   : > { %4031 = vmatprep.subr.mxu0 %v4406_v1  ;;  %4064 = vmatprep.subr.mxu1 %v4406_v1  ;;  %v420_v24 = vld [vmem:[%s5237_s1] sm:$0xff] }
  0x1d   : > { %4032 = vmatpush3.msra.mxu0 %v340_v6  ;;  %4065 = vmatpush3.msra.mxu1 %v422_v21 }
  0x1e   : > { %4033 = vmatprep.subr.mxu0 %v4406_v1  ;;  %4069 = vmatprep.subr.mxu1 %v4406_v1 }
  0x1f   : > { %4034 = vmatpush3.msra.mxu0 %v339_v7 }
  0x20   : > { %4035 = vmatprep.subr.mxu0 %v4406_v1 }
  0x21   : > { %4036 = vmatpush3.msra.mxu0 %v338_v8 }
  0x22   : > { %4037 = vmatprep.subr.mxu0 %v4406_v1 }
  0x23   : > { %4038 = vmatpush3.msra.mxu0 %v337_v9 }
  0x24   : > { %4039 = vmatprep.subr.mxu0 %v4406_v1 }
  0x25   : > { %4040 = vmatpush3.msra.mxu0 %v336_v10 }
  0x26   : > { %4041 = vmatprep.subr.mxu0 %v4406_v1 }
  0x27   : > { %4042 = vmatpush3.msra.mxu0 %v335_v11 }
  0x28   : > { %4043 = vmatprep.subr.mxu0 %v4406_v1 }
  0x29   : > { %4044 = vmatpush3.msra.mxu0 %v334_v12 }
  0x2a   : > { %4045 = vmatprep.subr.mxu0 %v4406_v1 }
  0x2b   : > { %4046 = vmatpush3.msra.mxu0 %v333_v13 }
  0x2c   : > { %4047 = vmatprep.subr.mxu0 %v4406_v1 }
  0x2d   : > { %4048 = vmatpush3.msra.mxu0 %v332_v14 }
  0x2e   : > { %4049 = vmatprep.subr.mxu0 %v4406_v1 }
  0x2f   : > { %4050 = vmatpush3.msra.mxu0 %v331_v15 }
  0x30   : > { %4051 = vmatprep.subr.mxu0 %v4406_v1 }
  0x31   : > { %4052 = vmatpush3.msra.mxu0 %v330_v16 }
  0x32   : > { %4053 = vmatprep.subr.mxu0 %v4406_v1 }
  0x33   : > { %4054 = vmatpush3.msra.mxu0 %v329_v17 }
  0x34   : > { %4056 = vmatmul.mubr.f32.vlgmr.msra.gmra.mxu0 %v328_v18  ;;  %4109 = vmatprep.subr.mxu0 %v4406_v1 }
  0x35   : > { %4117 = vmatprep.mubr.msk.f32.mxu0 %vm4407_vm0, %v4406_v1 }
  0xf4   : > { %v416_v23 = vpop.f32.mrf.mxu0 }
  0xf5   : > { %v417_v25 = vadd.f32 %v3830_v22, %v416_v23 }
  0xf6   : > { %v4057_v26 = vpop.f32.mrf.mxu0 }
  0xf7   : > { %v4616_v27 = vadd.f32 %v420_v24, %v417_v25 }
  0xf9   : > { %4067 = vmatmul.mubr.msk.f32.vlgmr.msra.gmra.mxu1 %vm431_vm1, %v4616_v27 }
  0xfa   : > { %4071 = vmatprep.mubr.msk.f32.mxu1 %vm4407_vm0, %v4406_v1 }
 0x1b9   : > { %v501_v29 = vpop.f32.mrf.mxu1 }
 0x1ba   : > { %v4625_v30 = vadd.f32 %v3831_v28, %v501_v29 }
 0x1bb   : > { %v4068_v31 = vpop.f32.mrf.mxu1 }
 0x1bc   : > { %512 = vrot.lane.b32.xlu1 %v4625_v30, %s4408_s24  ;;  %506 = vrot.lane.b32.xlu0 %v4625_v30, %s4409_s25 }
 0x1c0   : > { %651 = vrot.lane.b32.xlu1 %v4625_v30, %s4410_s26  ;;  %509 = vrot.lane.b32.xlu0 %v4625_v30, %s4411_s27 }
 0x22e   : > { %v4635_v32 = vpop.permute.xlu0 %506  ;;  %v4639_v33 = vpop.permute.xlu1 %512 }
 0x22f   : > { %653 = vrot.lane.b32.xlu0 %v4635_v32, %s4410_s26  ;;  %v531_v45 = vcombine.low %v4635_v32, %v4639_v33  ;;  %v532_v46 = vcombine.high %v4635_v32, %v4639_v33 }
 0x231   : > { %v539_v50 = vrot.slane %v531_v45, %v4651_v44  ;;  %v546_v51 = vrot.slane %v532_v46, %v4651_v44 }
 0x232   : > { %v4641_v34 = vpop.permute.xlu0 %509  ;;  %v652_v53 = vpop.permute.xlu1 %651 }
 0x233   : > { %657 = vrot.lane.b32.xlu0 %v4639_v33, %s4410_s26  ;;  %655 = vrot.lane.b32.xlu1 %v4641_v34, %s4410_s26  ;;  %v515_v42 = vcombine.low %v4625_v30, %v4641_v34  ;;  %v516_v43 = vcombine.high %v4625_v30, %v4641_v34 }
 0x235   : > { %v523_v48 = vrot.slane %v515_v42, %v4651_v44  ;;  %v530_v49 = vrot.slane %v516_v43, %v4651_v44 }
 0x237   : > { %v547_v54 = vcombine.low %v523_v48, %v539_v50  ;;  %v548_v55 = vcombine.high %v523_v48, %v539_v50  ;;  %v563_v56 = vcombine.low %v530_v49, %v546_v51  ;;  %v564_v57 = vcombine.high %v530_v49, %v546_v51 }
 0x239   : > { %v555_v59 = vrot.slane %v547_v54, %v4661_v52  ;;  %v562_v60 = vrot.slane %v548_v55, %v4661_v52  ;;  %v571_v61 = vrot.slane %v563_v56, %v4661_v52  ;;  %v578_v62 = vrot.slane %v564_v57, %v4661_v52 }
 0x23b   : > { %v583_v10 = vcombine.low %v555_v59, %v562_v60  ;;  %v3833_v11 = vcombine.high %v555_v59, %v562_v60  ;;  %v599_v12 = vcombine.low %v571_v61, %v578_v62  ;;  %v3834_v13 = vcombine.high %v571_v61, %v578_v62 }
 0x23d   : > { %v590_v22 = vrot.slane %v583_v10, %v4651_v44  ;;  %v598_v23 = vrot.slane %v3833_v11, %v4651_v44  ;;  %v606_v24 = vrot.slane %v599_v12, %v4651_v44  ;;  %v614_v25 = vrot.slane %v3834_v13, %v4651_v44 }
 0x23f   : > { %v615_v39 = vcombine.low %v590_v22, %v598_v23  ;;  %v631_v40 = vcombine.low %v606_v24, %v614_v25  ;;  %v632_v54 = vcombine.high %v606_v24, %v614_v25 }
 0x241   : > { %v623_v46 = vrot.slane %v615_v39, %v4661_v52  ;;  %v639_v47 = vrot.slane %v631_v40, %v4661_v52  ;;  %v646_v60 = vrot.slane %v632_v54, %v4661_v52 }
 0x243   : > { %v647_v51 = vcombine.low %v623_v46, %v639_v47 }
 0x2a1   : > { %v654_v58 = vpop.permute.xlu0 %653 }
 0x2a5   : > { %v656_v63 = vpop.permute.xlu1 %655  ;;  %v658_v0 = vpop.permute.xlu0 %657 }
 0x2a6   : > { %v663_v2 = vcombine.low %v652_v53, %v656_v63  ;;  %v664_v3 = vcombine.high %v652_v53, %v656_v63  ;;  %v679_v4 = vcombine.low %v654_v58, %v658_v0  ;;  %v680_v5 = vcombine.high %v654_v58, %v658_v0 }
 0x2a7   : > { %v616_v53 = vcombine.high %v590_v22, %v598_v23  ;;  %v648_v58 = vcombine.high %v623_v46, %v639_v47 }
 0x2a8   : > { %v671_v6 = vrot.slane %v663_v2, %v4651_v44  ;;  %v678_v7 = vrot.slane %v664_v3, %v4651_v44  ;;  %v687_v8 = vrot.slane %v679_v4, %v4651_v44  ;;  %v694_v9 = vrot.slane %v680_v5, %v4651_v44 }
 0x2a9   : > { %v630_v59 = vrot.slane %v616_v53, %v4661_v52 }
 0x2aa   : > { %v695_v14 = vcombine.low %v671_v6, %v687_v8  ;;  %v696_v15 = vcombine.high %v671_v6, %v687_v8  ;;  %v711_v16 = vcombine.low %v678_v7, %v694_v9  ;;  %v712_v17 = vcombine.high %v678_v7, %v694_v9 }
 0x2ab   : > { %v649_v62 = vcombine.low %v630_v59, %v646_v60  ;;  %v650_v0 = vcombine.high %v630_v59, %v646_v60 }
 0x2ac   : > { %v703_v18 = vrot.slane %v695_v14, %v4661_v52  ;;  %v710_v19 = vrot.slane %v696_v15, %v4661_v52  ;;  %v719_v20 = vrot.slane %v711_v16, %v4661_v52  ;;  %v726_v21 = vrot.slane %v712_v17, %v4661_v52 }
 0x2ae   : > { %v731_v26 = vcombine.low %v703_v18, %v710_v19  ;;  %v3835_v28 = vcombine.high %v703_v18, %v710_v19  ;;  %v747_v29 = vcombine.low %v719_v20, %v726_v21  ;;  %v3836_v31 = vcombine.high %v719_v20, %v726_v21 }
 0x2b0   : > { %v738_v35 = vrot.slane %v731_v26, %v4651_v44  ;;  %v746_v36 = vrot.slane %v3835_v28, %v4651_v44  ;;  %v754_v37 = vrot.slane %v747_v29, %v4651_v44  ;;  %v762_v38 = vrot.slane %v3836_v31, %v4651_v44 }
 0x2b2   : > { %v763_v41 = vcombine.low %v738_v35, %v746_v36  ;;  %v779_v42 = vcombine.low %v754_v37, %v762_v38  ;;  %v764_v48 = vcombine.high %v738_v35, %v746_v36  ;;  %v780_v49 = vcombine.high %v754_v37, %v762_v38 }
 0x2b4   : > { %v771_v43 = vrot.slane %v763_v41, %v4661_v52  ;;  %v787_v45 = vrot.slane %v779_v42, %v4661_v52  ;;  %v778_v56 = vrot.slane %v764_v48, %v4661_v52  ;;  %v794_v57 = vrot.slane %v780_v49, %v4661_v52 }
 0x2b6   : > { %v795_v50 = vcombine.low %v771_v43, %v787_v45  ;;  %v796_v55 = vcombine.high %v771_v43, %v787_v45  ;;  %v797_v61 = vcombine.low %v778_v56, %v794_v57  ;;  %v798_v63 = vcombine.high %v778_v56, %v794_v57 }
 0x2b8   : > { %4070 = vmatpush3.xpose.msk.msra.mxu1 %vm947_vm2, %v795_v50 }
 0x2b9   : > { %4074 = vmatprep.subr.mxu1 %v4406_v1 }
 0x2bb   : > { %4072 = vmatmul.mubr.msk.f32.vlgmr.msra.gmra.mxu1 %vm947_vm2, %v647_v51 }
 0x2bc   : > { %4075 = vmatpush3.xpose.msk.msra.mxu1 %vm947_vm2, %v796_v55  ;;  %4076 = vmatprep.mubr.msk.f32.mxu1 %vm4407_vm0, %v4406_v1 }
 0x2bd   : > { %4079 = vmatprep.subr.mxu1 %v4406_v1 }
 0x2bf   : > { %4077 = vmatmul.mubr.msk.f32.vlgmr.msra.gmra.mxu1 %vm947_vm2, %v648_v58 }
 0x2c0   : > { %4080 = vmatpush3.xpose.msk.msra.mxu1 %vm947_vm2, %v797_v61  ;;  %4081 = vmatprep.mubr.msk.f32.mxu1 %vm4407_vm0, %v4406_v1 }
 0x2c1   : > { %4084 = vmatprep.subr.mxu1 %v4406_v1 }
 0x2c3   : > { %4082 = vmatmul.mubr.msk.f32.vlgmr.msra.gmra.mxu1 %vm947_vm2, %v649_v62 }
 0x2c4   : > { %4085 = vmatpush3.xpose.msk.msra.mxu1 %vm947_vm2, %v798_v63  ;;  %4086 = vmatprep.mubr.msk.f32.mxu1 %vm4407_vm0, %v4406_v1 }
 0x2c5   : > { %4089 = vmatprep.subr.mxu1 %v4406_v1 }
 0x2c7   : > { %4087 = vmatmul.mubr.msk.f32.vlgmr.msra.gmra.mxu1 %vm947_vm2, %v650_v0 }
 0x2c8   : > { %4091 = vmatprep.mubr.msk.f32.mxu1 %vm4407_vm0, %v4406_v1 }
 0x37b   : > { %v1020_v2 = vpop.f32.mrf.mxu1 }
 0x37c   : > { %v1252_v3 = vsel %vm947_vm2, %v1020_v2, -inf }
 0x37d   : > { %1253 = vmax.xlane.f32.xlu1 %v1252_v3  ;;  %v4073_v4 = vpop.f32.mrf.mxu1 }
 0x37f   : > { %v1096_v5 = vpop.f32.mrf.mxu1 }
 0x380   : > { %v1255_v6 = vsel %vm947_vm2, %v1096_v5, -inf }
 0x381   : > { %1256 = vmax.xlane.f32.xlu0 %v1255_v6  ;;  %v4078_v7 = vpop.f32.mrf.mxu1 }
 0x383   : > { %v1172_v8 = vpop.f32.mrf.mxu1 }
 0x384   : > { %v1258_v9 = vsel %vm947_vm2, %v1172_v8, -inf }
 0x385   : > { %1259 = vmax.xlane.f32.xlu0 %v1258_v9  ;;  %v4083_v10 = vpop.f32.mrf.mxu1 }
 0x387   : > { %v1248_v11 = vpop.f32.mrf.mxu1 }
 0x388   : > { %v1261_v13 = vsel %vm947_vm2, %v1248_v11, -inf }
 0x389   : > { %v4088_v12 = vpop.f32.mrf.mxu1 }
 0x38e   : > { %799 = vrot.lane.b32.xlu1 %v4625_v30, %s5249_s28 }
 0x3b2   : > { %1262 = vmax.xlane.f32.xlu1 %v1261_v13 }
 0x3c3   : > { %803 = vrot.lane.b32.xlu1 %v4641_v34, %s5249_s28 }
 0x406   : > { %v1254_v14 = vpop.xlane.xlu1 %1253 }
 0x407   : > { %v1264_v15 = vsub.f32 %v1020_v2, %v1254_v14 }
 0x409   : > { %v1268_v16 = vmul.f32 1.442695, %v1264_v15 }
 0x40a   : > { %v1257_v17 = vpop.xlane.xlu0 %1256  ;;  %v800_v24 = vpop.permute.xlu1 %799 }
 0x40b   : > { %4304 = vpow2.f32 %v1268_v16  ;;  %v1265_v18 = vsub.f32 %v1096_v5, %v1257_v17 }
 0x40d   : > { %v1270_v19 = vmul.f32 1.442695, %v1265_v18 }
 0x40e   : > { %v1260_v34 = vpop.xlane.xlu0 %1259 }
 0x40f   : > { %4306 = vpow2.f32 %v1270_v19  ;;  %v1266_v23 = vsub.f32 %v1172_v8, %v1260_v34 }
 0x411   : > { %v1272_v25 = vmul.f32 1.442695, %v1266_v23 }
 0x413   : > { %4308 = vpow2.f32 %v1272_v25 }
 0x418   : > { %v4305_v20 = vpop.eup %4304 }
 0x419   : > { %v1276_v21 = vsel %vm947_vm2, %v4305_v20, 0.0 }
 0x41a   : > { %1277 = vadd.xlane.f32.xlu0 %v1276_v21 }
 0x41c   : > { %v4720_v22 = vpop.eup %4306 }
 0x41d   : > { %v1279_v30 = vsel %vm947_vm2, %v4720_v22, 0.0 }
 0x41e   : > { %1280 = vadd.xlane.f32.xlu1 %v1279_v30 }
 0x420   : > { %v4728_v31 = vpop.eup %4308 }
 0x421   : > { %v1282_v35 = vsel %vm947_vm2, %v4728_v31, 0.0 }
 0x42f   : > { %805 = vrot.lane.b32.xlu1 %v4639_v33, %s5249_s28 }
 0x430   : > { %801 = vrot.lane.b32.xlu0 %v4635_v32, %s5249_s28  ;;  %s5256_s28 = smov 24  }
 0x43b   : > { %v1263_v26 = vpop.xlane.xlu1 %1262 }
 0x43c   : > { %v1267_v28 = vsub.f32 %v1248_v11, %v1263_v26 }
 0x43e   : > { %v1274_v29 = vmul.f32 1.442695, %v1267_v28 }
 0x43f   : > { %v804_v33 = vpop.permute.xlu1 %803 }
 0x440   : > { %4310 = vpow2.f32 %v1274_v29  ;;  %v811_v39 = vcombine.low %v800_v24, %v804_v33  ;;  %v812_v40 = vcombine.high %v800_v24, %v804_v33 }
 0x442   : > { %v819_v46 = vrot.slane %v811_v39, %v4651_v44  ;;  %v826_v47 = vrot.slane %v812_v40, %v4651_v44 }
 0x44d   : > { %v4732_v36 = vpop.eup %4310 }
 0x44e   : > { %v1285_v32 = vsel %vm947_vm2, %v4732_v36, 0.0 }
 0x44f   : > { %1283 = vadd.xlane.f32.xlu0 %v1282_v35 }
 0x453   : > { %1286 = vadd.xlane.f32.xlu0 %v1285_v32 }
 0x4a3   : > { %v1278_v37 = vpop.xlane.xlu0 %1277 }
 0x4a4   : > { %4312 = vrcp.f32 %v1278_v37 }
 0x4a7   : > { %v1281_v38 = vpop.xlane.xlu1 %1280  ;;  %v802_v41 = vpop.permute.xlu0 %801 }
 0x4a8   : > { %4314 = vrcp.f32 %v1281_v38 }
 0x4ab   : > { %v806_v42 = vpop.permute.xlu1 %805 }
 0x4ac   : > { %v827_v43 = vcombine.low %v802_v41, %v806_v42  ;;  %v828_v45 = vcombine.high %v802_v41, %v806_v42 }
 0x4ae   : > { %v835_v48 = vrot.slane %v827_v43, %v4651_v44  ;;  %v842_v49 = vrot.slane %v828_v45, %v4651_v44 }
 0x4b0   : > { %v843_v50 = vcombine.low %v819_v46, %v835_v48  ;;  %v844_v51 = vcombine.high %v819_v46, %v835_v48  ;;  %v859_v53 = vcombine.low %v826_v47, %v842_v49  ;;  %v860_v54 = vcombine.high %v826_v47, %v842_v49  ;;  %v1744_v48 = vld [vmem:[%s5240_s4 + $0x18] sm:$0xff] }
 0x4b1   : > { %v4313_v6 = vpop.eup %4312  ;;  %4110 = vmatpush3.msra.mxu0 %v1744_v48 }
 0x4b2   : > { %v851_v55 = vrot.slane %v843_v50, %v4661_v52  ;;  %v858_v56 = vrot.slane %v844_v51, %v4661_v52  ;;  %v867_v57 = vrot.slane %v859_v53, %v4661_v52  ;;  %v874_v58 = vrot.slane %v860_v54, %v4661_v52  ;;  %4111 = vmatprep.subr.mxu0 %v4406_v1 }
 0x4b3   : > { %v1292_v12 = vmul.f32 %v4313_v6, %v4305_v20 }
 0x4b4   : > { %v879_v59 = vcombine.low %v851_v55, %v858_v56  ;;  %v3837_v60 = vcombine.high %v851_v55, %v858_v56  ;;  %v895_v61 = vcombine.low %v867_v57, %v874_v58  ;;  %v3838_v62 = vcombine.high %v867_v57, %v874_v58  ;;  %v1743_v58 = vld [vmem:[%s5240_s4 + $0x10] sm:$0xff] }
 0x4b5   : > { %v4315_v13 = vpop.eup %4314  ;;  %4112 = vmatpush3.msra.mxu0 %v1743_v58 }
 0x4b6   : > { %v886_v63 = vrot.slane %v879_v59, %v4651_v44  ;;  %v894_v0 = vrot.slane %v3837_v60, %v4651_v44  ;;  %v902_v2 = vrot.slane %v895_v61, %v4651_v44  ;;  %v910_v3 = vrot.slane %v3838_v62, %v4651_v44  ;;  %v1742_v59 = vld [vmem:[%s5240_s4 + $0x8] sm:$0xff]  ;;  %4113 = vmatprep.subr.mxu0 %v4406_v1 }
 0x4b7   : > { %v1293_v17 = vmul.f32 %v4315_v13, %v4720_v22  ;;  %4114 = vmatpush3.msra.mxu0 %v1742_v59  ;;  %v3859_v59 = vld [vmem:[%s5244_s8 + $0x6] ss:$0 sm:$0xff] }
 0x4b8   : > { %v911_v4 = vcombine.low %v886_v63, %v894_v0  ;;  %v927_v5 = vcombine.low %v902_v2, %v910_v3  ;;  %v912_v9 = vcombine.high %v886_v63, %v894_v0  ;;  %v928_v10 = vcombine.high %v902_v2, %v910_v3  ;;  %4115 = vmatprep.subr.mxu0 %v4406_v1 }
 0x4ba   : > { %v919_v7 = vrot.slane %v911_v4, %v4661_v52  ;;  %v935_v8 = vrot.slane %v927_v5, %v4661_v52  ;;  %v926_v15 = vrot.slane %v912_v9, %v4661_v52  ;;  %v942_v16 = vrot.slane %v928_v10, %v4661_v52  ;;  %v1741_v5 = vld [vmem:[%s5240_s4] sm:$0xff] }
 0x4bb   : > { %4116 = vmatpush3.msra.mxu0 %v1741_v5 }
 0x4bc   : > { %v943_v11 = vcombine.low %v919_v7, %v935_v8  ;;  %v944_v14 = vcombine.high %v919_v7, %v935_v8  ;;  %v945_v18 = vcombine.low %v926_v15, %v942_v16  ;;  %v946_v34 = vcombine.high %v926_v15, %v942_v16  ;;  %4131 = vmatprep.subr.mxu0 %v4406_v1 }
 0x4be   : > { %4090 = vmatpush3.msra.mxu1 %v943_v11 }
 0x4bf   : > { %4092 = vmatmul.mubr.msk.f32.vlgmr.msra.gmra.mxu1 %vm947_vm2, %v1292_v12  ;;  %4094 = vmatprep.subr.mxu1 %v4406_v1 }
 0x4c0   : > { %4095 = vmatpush3.msra.mxu1 %v944_v14  ;;  %4096 = vmatprep.mubr.msk.f32.mxu1 %vm4407_vm0, %v4406_v1 }
 0x4c1   : > { %4099 = vmatprep.subr.mxu1 %v4406_v1 }
 0x4c3   : > { %4097 = vmatmul.mubr.msk.f32.vlgmr.msra.gmra.mxu1 %vm947_vm2, %v1293_v17 }
 0x4c4   : > { %4100 = vmatpush3.msra.mxu1 %v945_v18  ;;  %4101 = vmatprep.mubr.msk.f32.mxu1 %vm4407_vm0, %v4406_v1 }
 0x4c5   : > { %4104 = vmatprep.subr.mxu1 %v4406_v1 }
 0x4d8   : > { %v1284_v19 = vpop.xlane.xlu0 %1283 }
 0x4d9   : > { %4316 = vrcp.f32 %v1284_v19 }
 0x4dc   : > { %v1287_v20 = vpop.xlane.xlu0 %1286 }
 0x4dd   : > { %4318 = vrcp.f32 %v1287_v20  ;;  %v3853_v20 = vld [vmem:[%s5244_s8 + $0x2] ss:$0 sm:$0xff] }
 0x4e6   : > { %v4317_v21 = vpop.eup %4316 }
 0x4e7   : > { %v1294_v30 = vmul.f32 %v4317_v21, %v4728_v31 }
 0x4e9   : > { %4102 = vmatmul.mubr.msk.f32.vlgmr.msra.gmra.mxu1 %vm947_vm2, %v1294_v30 }
 0x4ea   : > { %v4319_v22 = vpop.eup %4318  ;;  %4105 = vmatpush3.msra.mxu1 %v946_v34  ;;  %4106 = vmatprep.mubr.msk.f32.mxu1 %vm4407_vm0, %v4406_v1 }
 0x4eb   : > { %v1295_v23 = vmul.f32 %v4319_v22, %v4732_v36  ;;  %4120 = vmatprep.subr.mxu1 %v4406_v1 }
 0x4ed   : > { %4107 = vmatmul.mubr.msk.f32.vlgmr.msra.gmra.mxu1 %vm947_vm2, %v1295_v23 }
 0x4ee   : > { %4128 = vmatprep.mubr.msk.f32.mxu1 %vm4407_vm0, %v4406_v1 }
 0x57f   : > { %v1365_v24 = vpop.f32.mrf.mxu1 }
 0x581   : > { %v4093_v25 = vpop.f32.mrf.mxu1 }
 0x583   : > { %v1438_v26 = vpop.f32.mrf.mxu1 }
 0x585   : > { %v4098_v28 = vpop.f32.mrf.mxu1 }
 0x5a9   : > { %v1511_v29 = vpop.f32.mrf.mxu1 }
 0x5aa   : > { %v1588_v35 = vcombine.low %v1365_v24, %v1511_v29  ;;  %v1589_v32 = vcombine.high %v1365_v24, %v1511_v29 }
 0x5ab   : > { %v4103_v31 = vpop.f32.mrf.mxu1 }
 0x5ac   : > { %v1596_v36 = vrot.slane %v1588_v35, %v4651_v44  ;;  %v1603_v40 = vrot.slane %v1589_v32, %v4651_v44  ;;  %v1853_v31 = vld [vmem:[%s5241_s5 + $0x18] sm:$0xff]  ;;  %v1852_v35 = vld [vmem:[%s5241_s5 + $0x10] sm:$0xff]  ;;  %v1850_v32 = vld [vmem:[%s5241_s5] sm:$0xff] }
 0x5ad   : > { %v1584_v33 = vpop.f32.mrf.mxu1  ;;  %4121 = vmatpush3.msra.mxu1 %v1853_v31 }
 0x5ae   : > { %v1604_v37 = vcombine.low %v1438_v26, %v1584_v33  ;;  %v1605_v38 = vcombine.high %v1438_v26, %v1584_v33  ;;  %4122 = vmatprep.subr.mxu1 %v4406_v1  ;;  %v1940_v33 = vld [vmem:[%s5242_s6 + $0x38] sm:$0xff] }
 0x5af   : > { %v4108_v39 = vpop.f32.mrf.mxu1  ;;  %4123 = vmatpush3.msra.mxu1 %v1852_v35 }
 0x5b0   : > { %v1612_v41 = vrot.slane %v1604_v37, %v4651_v44  ;;  %v1619_v42 = vrot.slane %v1605_v38, %v4651_v44  ;;  %4124 = vmatprep.subr.mxu1 %v4406_v1  ;;  %v1939_v37 = vld [vmem:[%s5242_s6 + $0x30] sm:$0xff]  ;;  %v1938_v38 = vld [vmem:[%s5242_s6 + $0x28] sm:$0xff]  ;;  %v1937_v39 = vld [vmem:[%s5242_s6 + $0x20] sm:$0xff] }
 0x5b2   : > { %v1620_v43 = vcombine.low %v1596_v36, %v1612_v41  ;;  %v1621_v45 = vcombine.high %v1596_v36, %v1612_v41  ;;  %v1636_v46 = vcombine.low %v1603_v40, %v1619_v42  ;;  %v1637_v47 = vcombine.high %v1603_v40, %v1619_v42  ;;  %v1936_v36 = vld [vmem:[%s5242_s6 + $0x18] sm:$0xff] }
 0x5b4   : > { %v1628_v49 = vrot.slane %v1620_v43, %v4661_v52  ;;  %v1635_v50 = vrot.slane %v1621_v45, %v4661_v52  ;;  %v1644_v51 = vrot.slane %v1636_v46, %v4661_v52  ;;  %v1651_v53 = vrot.slane %v1637_v47, %v4661_v52  ;;  %v3855_v45 = vld [vmem:[%s5244_s8 + $0x3] ss:$0 sm:$0xff]  ;;  %v3856_v47 = vld [vmem:[%s5244_s8 + $0x4] ss:$0 sm:$0xff] }
 0x5b6   : > { %v1656_v54 = vcombine.low %v1628_v49, %v1635_v50  ;;  %v3851_v55 = vcombine.high %v1628_v49, %v1635_v50  ;;  %v1672_v56 = vcombine.low %v1644_v51, %v1651_v53  ;;  %v3852_v57 = vcombine.high %v1644_v51, %v1651_v53  ;;  %v1935_v50 = vld [vmem:[%s5242_s6 + $0x10] sm:$0xff]  ;;  %v1934_v51 = vld [vmem:[%s5242_s6 + $0x8] sm:$0xff]  ;;  %v1933_v53 = vld [vmem:[%s5242_s6] sm:$0xff] }
 0x5b8   : > { %v1663_v60 = vrot.slane %v1656_v54, %v4651_v44  ;;  %v1671_v61 = vrot.slane %v3851_v55, %v4651_v44  ;;  %v1679_v62 = vrot.slane %v1672_v56, %v4651_v44  ;;  %v1687_v63 = vrot.slane %v3852_v57, %v4651_v44  ;;  %v3857_v54 = vld [vmem:[%s5244_s8 + $0x5] ss:$0 sm:$0xff] }
 0x5ba   : > { %v1688_v0 = vcombine.low %v1663_v60, %v1671_v61  ;;  %v1704_v2 = vcombine.low %v1679_v62, %v1687_v63  ;;  %v1689_v3 = vcombine.high %v1663_v60, %v1671_v61  ;;  %v1705_v4 = vcombine.high %v1679_v62, %v1687_v63 }
 0x5bc   : > { %v1696_v6 = vrot.slane %v1688_v0, %v4661_v52  ;;  %v1712_v7 = vrot.slane %v1704_v2, %v4661_v52  ;;  %v1703_v9 = vrot.slane %v1689_v3, %v4661_v52  ;;  %v1719_v10 = vrot.slane %v1705_v4, %v4661_v52 }
 0x5be   : > { %v1721_v8 = vcombine.high %v1696_v6, %v1712_v7  ;;  %v1720_v11 = vcombine.low %v1696_v6, %v1712_v7  ;;  %v1722_v12 = vcombine.low %v1703_v9, %v1719_v10  ;;  %v1723_v13 = vcombine.high %v1703_v9, %v1719_v10  ;;  %v3866_v7 = vld [vmem:[%s5239_s3 + $0x38] sm:$0xff]  ;;  %v3864_v9 = vld [vmem:[%s5239_s3 + $0x28] sm:$0xff]  ;;  %v3863_v10 = vld [vmem:[%s5239_s3 + $0x20] sm:$0xff] }
 0x5c0   : > { %1725 = vrot.lane.b32.xlu1 %v1721_v8, %s5247_s14  ;;  %v3865_v8 = vld [vmem:[%s5239_s3 + $0x30] sm:$0xff]  ;;  %s5255_s14 = smov 8  }
 0x5c4   : > { %1729 = vrot.lane.b32.xlu1 %v1722_v12, %s5248_s16 }
 0x5c8   : > { %1733 = vrot.lane.b32.xlu1 %v1723_v13, %s5246_s17 }
 0x632   : > { %v1726_v14 = vpop.permute.xlu1 %1725 }
 0x633   : > { %v1736_v16 = vsel %vm947_vm2, %v1720_v11, %v1726_v14 }
 0x636   : > { %v1730_v15 = vpop.permute.xlu1 %1729 }
 0x637   : > { %v1738_v17 = vsel %vm1737_vm3, %v1736_v16, %v1730_v15  ;;  %v3861_v15 = vld [vmem:[%s5244_s8 + $0x7] ss:$0 sm:$0xff] }
 0x63a   : > { %v1734_v18 = vpop.permute.xlu1 %1733 }
 0x63b   : > { %v1740_v19 = vsel %vm1739_vm4, %v1738_v17, %v1734_v18  ;;  %v3862_v17 = vld [vmem:[%s5244_s8 + $0x8] ss:$0 sm:$0xff] }
 0x63c   : > { %4118 = vmatmul.mubr.msk.f32.vlgmr.msra.gmra.mxu0 %vm431_vm1, %v1740_v19 }
 0x63d   : > { %4147 = vmatprep.mubr.msk.f32.mxu0 %vm4407_vm0, %v4406_v1  ;;  %4132 = vmatpush3.msra.mxu0 %v1940_v33 }
 0x63e   : > { %4133 = vmatprep.subr.mxu0 %v4406_v1 }
 0x63f   : > { %4134 = vmatpush3.msra.mxu0 %v1939_v37 }
 0x640   : > { %4135 = vmatprep.subr.mxu0 %v4406_v1 }
 0x641   : > { %4136 = vmatpush3.msra.mxu0 %v1938_v38 }
 0x642   : > { %4137 = vmatprep.subr.mxu0 %v4406_v1 }
 0x643   : > { %4138 = vmatpush3.msra.mxu0 %v1937_v39 }
 0x644   : > { %4139 = vmatprep.subr.mxu0 %v4406_v1 }
 0x645   : > { %4140 = vmatpush3.msra.mxu0 %v1936_v36 }
 0x646   : > { %4141 = vmatprep.subr.mxu0 %v4406_v1 }
 0x647   : > { %4142 = vmatpush3.msra.mxu0 %v1935_v50 }
 0x648   : > { %4143 = vmatprep.subr.mxu0 %v4406_v1 }
 0x649   : > { %4144 = vmatpush3.msra.mxu0 %v1934_v51 }
 0x64a   : > { %4145 = vmatprep.subr.mxu0 %v4406_v1 }
 0x64b   : > { %4146 = vmatpush3.msra.mxu0 %v1933_v53 }
 0x64c   : > { %4171 = vmatprep.subr.mxu0 %v4406_v1 }
 0x6fc   : > { %v1819_v21 = vpop.f32.mrf.mxu0 }
 0x6fd   : > { %v1820_v30 = vadd.f32 %v3853_v20, %v1819_v21  ;;  %v3867_v20 = vld [vmem:[%s5244_s8 + $0x9] ss:$0 sm:$0xff] }
 0x6fe   : > { %v4119_v34 = vpop.f32.mrf.mxu0 }
 0x6ff   : > { %v1823_v22 = vadd.f32 %v1820_v30, %v4616_v27  ;;  %v1851_v27 = vld [vmem:[%s5241_s5 + $0x8] sm:$0xff] }
 0x700   : > { %4125 = vmatpush3.msra.mxu1 %v1851_v27 }
 0x701   : > { %v1826_v23 = vsel %vm431_vm1, %v1823_v22, 0.0  ;;  %4126 = vmatprep.subr.mxu1 %v4406_v1 }
 0x702   : > { %1827 = vadd.xlane.f32.xlu1 %v1826_v23  ;;  %4127 = vmatpush3.msra.mxu1 %v1850_v32 }
 0x703   : > { %4150 = vmatprep.subr.mxu1 %v4406_v1 }
 0x78b   : > { %v1828_v24 = vpop.xlane.xlu1 %1827 }
 0x78c   : > { %v1830_v25 = vmul.f32 0.03125, %v1828_v24 }
 0x78e   : > { %v1831_v26 = vsub.f32 %v1823_v22, %v1830_v25 }
 0x790   : > { %v1832_v28 = vmul.f32 %v1831_v26, %v1831_v26 }
 0x792   : > { %v1833_v29 = vsel %vm431_vm1, %v1832_v28, 0.0 }
 0x793   : > { %1834 = vadd.xlane.f32.xlu0 %v1833_v29 }
 0x81c   : > { %v1835_v40 = vpop.xlane.xlu0 %1834 }
 0x81d   : > { %v1836_v41 = vmul.f32 0.03125, %v1835_v40 }
 0x81f   : > { %v1837_v42 = vadd.f32 1e-05, %v1836_v41 }
 0x821   : > { %4320 = vrsqrt.f32 %v1837_v42 }
 0x82e   : > { %v4321_v43 = vpop.eup %4320 }
 0x82f   : > { %v1839_v46 = vmul.f32 %v4321_v43, %v1831_v26 }
 0x831   : > { %v1844_v48 = vmul.f32 %v3855_v45, %v1839_v46 }
 0x833   : > { %v1849_v49 = vadd.f32 %v3856_v47, %v1844_v48 }
 0x835   : > { %4129 = vmatmul.mubr.msk.f32.vlgmr.msra.gmra.mxu1 %vm431_vm1, %v1849_v49 }
 0x836   : > { %4158 = vmatprep.mubr.msk.f32.mxu1 %vm4407_vm0, %v4406_v1  ;;  %4151 = vmatpush3.msra.mxu1 %v3866_v7 }
 0x837   : > { %4152 = vmatprep.subr.mxu1 %v4406_v1 }
 0x838   : > { %4153 = vmatpush3.msra.mxu1 %v3865_v8 }
 0x839   : > { %4154 = vmatprep.subr.mxu1 %v4406_v1 }
 0x83a   : > { %4155 = vmatpush3.msra.mxu1 %v3864_v9 }
 0x83b   : > { %4156 = vmatprep.subr.mxu1 %v4406_v1 }
 0x83c   : > { %4157 = vmatpush3.msra.mxu1 %v3863_v10 }
 0x83d   : > { %4161 = vmatprep.subr.mxu1 %v4406_v1 }
 0x8f5   : > { %v1928_v55 = vpop.f32.mrf.mxu1 }
 0x8f6   : > { %v1929_v56 = vadd.f32 %v3857_v54, %v1928_v55 }
 0x8f7   : > { %v4130_v57 = vpop.f32.mrf.mxu1 }
 0x8f8   : > { %v1932_v58 = vmax.f32 %v1929_v56, 0.0 }
 0x8fa   : > { %4148 = vmatmul.mubr.msk.f32.vlgmr.msra.gmra.mxu0 %vm1946_vm5, %v1932_v58 }
 0x8fb   : > { %4173 = vmatprep.mubr.msk.f32.mxu0 %vm4407_vm0, %v4406_v1 }
 0x9ba   : > { %v2016_v60 = vpop.f32.mrf.mxu0 }
 0x9bb   : > { %v2017_v61 = vadd.f32 %v3859_v59, %v2016_v60 }
 0x9bc   : > { %v4149_v62 = vpop.f32.mrf.mxu0 }
 0x9bd   : > { %v2020_v63 = vadd.f32 %v2017_v61, %v1849_v49 }
 0x9bf   : > { %v2023_v0 = vsel %vm431_vm1, %v2020_v63, 0.0 }
 0x9c0   : > { %2024 = vadd.xlane.f32.xlu0 %v2023_v0 }
 0xa49   : > { %v2025_v2 = vpop.xlane.xlu0 %2024 }
 0xa4a   : > { %v2026_v3 = vmul.f32 0.03125, %v2025_v2 }
 0xa4c   : > { %v2027_v4 = vsub.f32 %v2020_v63, %v2026_v3 }
 0xa4e   : > { %v2028_v5 = vmul.f32 %v2027_v4, %v2027_v4 }
 0xa50   : > { %v2029_v6 = vsel %vm431_vm1, %v2028_v5, 0.0 }
 0xa51   : > { %2030 = vadd.xlane.f32.xlu0 %v2029_v6 }
 0xada   : > { %v2031_v11 = vpop.xlane.xlu0 %2030 }
 0xadb   : > { %v2032_v12 = vmul.f32 0.03125, %v2031_v11 }
 0xadd   : > { %v2033_v13 = vadd.f32 1e-05, %v2032_v12 }
 0xadf   : > { %4322 = vrsqrt.f32 %v2033_v13 }
 0xaec   : > { %v4323_v14 = vpop.eup %4322 }
 0xaed   : > { %v2035_v16 = vmul.f32 %v4323_v14, %v2027_v4 }
 0xaef   : > { %v2040_v18 = vmul.f32 %v3861_v15, %v2035_v16 }
 0xaf1   : > { %v4908_v19 = vadd.f32 %v3862_v17, %v2040_v18 }
 0xaf3   : > { %4159 = vmatmul.mubr.msk.f32.vlgmr.msra.gmra.mxu1 %vm431_vm1, %v4908_v19 }
 0xaf4   : > { %4163 = vmatprep.mubr.msk.f32.mxu1 %vm4407_vm0, %v4406_v1 }
 0xbb3   : > { %v2125_v21 = vpop.f32.mrf.mxu1 }
 0xbb4   : > { %v4917_v30 = vadd.f32 %v3867_v20, %v2125_v21 }
 0xbb5   : > { %v4160_v34 = vpop.f32.mrf.mxu1 }
 0xbb6   : > { %2133 = vrot.lane.b32.xlu1 %v4917_v30, %s4411_s27  ;;  %2130 = vrot.lane.b32.xlu0 %v4917_v30, %s4409_s25 }
 0xbba   : > { %2275 = vrot.lane.b32.xlu1 %v4917_v30, %s4410_s26  ;;  %2136 = vrot.lane.b32.xlu0 %v4917_v30, %s4408_s24  ;;  %s5253_s24 = smov 64  }
 0xc28   : > { %v4927_v22 = vpop.permute.xlu1 %2133  ;;  %v4929_v23 = vpop.permute.xlu0 %2130 }
 0xc29   : > { %2279 = vrot.lane.b32.xlu1 %v4927_v22, %s4410_s26  ;;  %2277 = vrot.lane.b32.xlu0 %v4929_v23, %s4410_s26  ;;  %v2139_v28 = vcombine.low %v4917_v30, %v4927_v22  ;;  %v2140_v29 = vcombine.high %v4917_v30, %v4927_v22 }
 0xc2b   : > { %v2147_v32 = vrot.slane %v2139_v28, %v4651_v44  ;;  %v2154_v33 = vrot.slane %v2140_v29, %v4651_v44 }
 0xc2c   : > { %v4935_v24 = vpop.permute.xlu0 %2136  ;;  %v2276_v31 = vpop.permute.xlu1 %2275 }
 0xc2d   : > { %2281 = vrot.lane.b32.xlu0 %v4935_v24, %s4410_s26  ;;  %v2155_v25 = vcombine.low %v4929_v23, %v4935_v24  ;;  %v2156_v26 = vcombine.high %v4929_v23, %v4935_v24  ;;  %s3918_s26 = sshll.u32 %s4490_s13, 7 }
 0xc2e   : > { %s5201_s29 = scalar_lea.hbm %s5245_s9, %s3918_s26 }
 0xc2f   : > { %v2163_v35 = vrot.slane %v2155_v25, %v4651_v44  ;;  %v2170_v27 = vrot.slane %v2156_v26, %v4651_v44 }
 0xc31   : > { %v2171_v37 = vcombine.low %v2147_v32, %v2163_v35  ;;  %v2172_v38 = vcombine.high %v2147_v32, %v2163_v35  ;;  %v2187_v39 = vcombine.low %v2154_v33, %v2170_v27  ;;  %v2188_v36 = vcombine.high %v2154_v33, %v2170_v27 }
 0xc33   : > { %v2179_v45 = vrot.slane %v2171_v37, %v4661_v52  ;;  %v2186_v46 = vrot.slane %v2172_v38, %v4661_v52  ;;  %v2195_v47 = vrot.slane %v2187_v39, %v4661_v52  ;;  %v2202_v48 = vrot.slane %v2188_v36, %v4661_v52 }
 0xc35   : > { %v2207_v57 = vcombine.low %v2179_v45, %v2186_v46  ;;  %v3869_v58 = vcombine.high %v2179_v45, %v2186_v46  ;;  %v2223_v59 = vcombine.low %v2195_v47, %v2202_v48  ;;  %v3870_v60 = vcombine.high %v2195_v47, %v2202_v48 }
 0xc37   : > { %v2214_v6 = vrot.slane %v2207_v57, %v4651_v44  ;;  %v2222_v7 = vrot.slane %v3869_v58, %v4651_v44  ;;  %v2230_v8 = vrot.slane %v2223_v59, %v4651_v44  ;;  %v2238_v9 = vrot.slane %v3870_v60, %v4651_v44 }
 0xc39   : > { %v2239_v18 = vcombine.low %v2214_v6, %v2222_v7  ;;  %v2255_v20 = vcombine.low %v2230_v8, %v2238_v9  ;;  %v2240_v21 = vcombine.high %v2214_v6, %v2222_v7  ;;  %v2256_v34 = vcombine.high %v2230_v8, %v2238_v9 }
 0xc3b   : > { %v2247_v33 = vrot.slane %v2239_v18, %v4661_v52  ;;  %v2263_v37 = vrot.slane %v2255_v20, %v4661_v52  ;;  %v2254_v38 = vrot.slane %v2240_v21, %v4661_v52  ;;  %v2270_v39 = vrot.slane %v2256_v34, %v4661_v52 }
 0xc3d   : > { %v2272_v45 = vcombine.high %v2247_v33, %v2263_v37  ;;  %v2274_v47 = vcombine.high %v2254_v38, %v2270_v39 }
 0xc9b   : > { %v2280_v40 = vpop.permute.xlu1 %2279  ;;  %v2278_v41 = vpop.permute.xlu0 %2277 }
 0xc9c   : > { %v2287_v42 = vcombine.low %v2276_v31, %v2280_v40  ;;  %v2288_v43 = vcombine.high %v2276_v31, %v2280_v40 }
 0xc9e   : > { %v2295_v53 = vrot.slane %v2287_v42, %v4651_v44  ;;  %v2302_v54 = vrot.slane %v2288_v43, %v4651_v44  ;;  %v2273_v42 = vcombine.low %v2254_v38, %v2270_v39 }
 0xc9f   : > { %v2282_v49 = vpop.permute.xlu0 %2281 }
 0xca0   : > { %v2303_v50 = vcombine.low %v2278_v41, %v2282_v49  ;;  %v2304_v51 = vcombine.high %v2278_v41, %v2282_v49  ;;  %v2271_v41 = vcombine.low %v2247_v33, %v2263_v37 }
 0xca2   : > { %v2311_v55 = vrot.slane %v2303_v50, %v4651_v44  ;;  %v2318_v56 = vrot.slane %v2304_v51, %v4651_v44 }
 0xca4   : > { %v2319_v61 = vcombine.low %v2295_v53, %v2311_v55  ;;  %v2320_v62 = vcombine.high %v2295_v53, %v2311_v55  ;;  %v2335_v63 = vcombine.low %v2302_v54, %v2318_v56  ;;  %v2336_v0 = vcombine.high %v2302_v54, %v2318_v56 }
 0xca6   : > { %v2327_v2 = vrot.slane %v2319_v61, %v4661_v52  ;;  %v2334_v3 = vrot.slane %v2320_v62, %v4661_v52  ;;  %v2343_v4 = vrot.slane %v2335_v63, %v4661_v52  ;;  %v2350_v5 = vrot.slane %v2336_v0, %v4661_v52 }
 0xca8   : > { %v2355_v10 = vcombine.low %v2327_v2, %v2334_v3  ;;  %v3871_v11 = vcombine.high %v2327_v2, %v2334_v3  ;;  %v2371_v12 = vcombine.low %v2343_v4, %v2350_v5  ;;  %v3872_v13 = vcombine.high %v2343_v4, %v2350_v5 }
 0xcaa   : > { %v2362_v14 = vrot.slane %v2355_v10, %v4651_v44  ;;  %v2370_v15 = vrot.slane %v3871_v11, %v4651_v44  ;;  %v2378_v16 = vrot.slane %v2371_v12, %v4651_v44  ;;  %v2386_v17 = vrot.slane %v3872_v13, %v4651_v44 }
 0xcac   : > { %v2387_v25 = vcombine.low %v2362_v14, %v2370_v15  ;;  %v2388_v26 = vcombine.high %v2362_v14, %v2370_v15  ;;  %v2403_v28 = vcombine.low %v2378_v16, %v2386_v17  ;;  %v2404_v29 = vcombine.high %v2378_v16, %v2386_v17 }
 0xcae   : > { %v2395_v31 = vrot.slane %v2387_v25, %v4661_v52  ;;  %v2411_v35 = vrot.slane %v2403_v28, %v4661_v52  ;;  %v2402_v27 = vrot.slane %v2388_v26, %v4661_v52  ;;  %v2418_v32 = vrot.slane %v2404_v29, %v4661_v52 }
 0xcb0   : > { %v2419_v36 = vcombine.low %v2395_v31, %v2411_v35  ;;  %v2421_v40 = vcombine.low %v2402_v27, %v2418_v32  ;;  %v2420_v43 = vcombine.high %v2395_v31, %v2411_v35  ;;  %v2422_v46 = vcombine.high %v2402_v27, %v2418_v32 }
 0xcb2   : > { %4162 = vmatpush3.xpose.msk.msra.mxu1 %vm947_vm2, %v2419_v36  ;;  %4172 = vmatpush3.xpose.msk.msra.mxu0 %vm947_vm2, %v2421_v40 }
 0xcb3   : > { %4166 = vmatprep.subr.mxu1 %v4406_v1  ;;  %4181 = vmatprep.subr.mxu0 %v4406_v1 }
 0xcb5   : > { %4164 = vmatmul.mubr.msk.f32.vlgmr.msra.gmra.mxu1 %vm947_vm2, %v2271_v41  ;;  %4174 = vmatmul.mubr.msk.f32.vlgmr.msra.gmra.mxu0 %vm947_vm2, %v2273_v42 }
 0xcb6   : > { %4167 = vmatpush3.xpose.msk.msra.mxu1 %vm947_vm2, %v2420_v43  ;;  %4168 = vmatprep.mubr.msk.f32.mxu1 %vm4407_vm0, %v4406_v1 }
 0xcb7   : > { %4176 = vmatprep.subr.mxu1 %v4406_v1  ;;  %4183 = vmatprep.mubr.msk.f32.mxu0 %vm4407_vm0, %v4406_v1 }
 0xcb9   : > { %4169 = vmatmul.mubr.msk.f32.vlgmr.msra.gmra.mxu1 %vm947_vm2, %v2272_v45 }
 0xcba   : > { %4177 = vmatpush3.xpose.msk.msra.mxu1 %vm947_vm2, %v2422_v46  ;;  %4178 = vmatprep.mubr.msk.f32.mxu1 %vm4407_vm0, %v4406_v1 }
 0xcbb   : > { %4186 = vmatprep.subr.mxu1 %v4406_v1 }
 0xcbd   : > { %4179 = vmatmul.mubr.msk.f32.vlgmr.msra.gmra.mxu1 %vm947_vm2, %v2274_v47 }
 0xcbe   : > { %4188 = vmatprep.mubr.msk.f32.mxu1 %vm4407_vm0, %v4406_v1 }
 0xd75   : > { %v2643_v48 = vpop.f32.mrf.mxu1  ;;  %v2795_v49 = vpop.f32.mrf.mxu0 }
 0xd76   : > { %v2875_v50 = vsel %vm947_vm2, %v2643_v48, -inf  ;;  %v2881_v59 = vsel %vm947_vm2, %v2795_v49, -inf }
 0xd77   : > { %2876 = vmax.xlane.f32.xlu1 %v2875_v50  ;;  %v4165_v51 = vpop.f32.mrf.mxu1  ;;  %v4175_v53 = vpop.f32.mrf.mxu0 }
 0xd79   : > { %v2719_v54 = vpop.f32.mrf.mxu1 }
 0xd7a   : > { %v2878_v55 = vsel %vm947_vm2, %v2719_v54, -inf }
 0xd7b   : > { %2879 = vmax.xlane.f32.xlu0 %v2878_v55  ;;  %v4170_v56 = vpop.f32.mrf.mxu1 }
 0xd7d   : > { %v2871_v57 = vpop.f32.mrf.mxu1 }
 0xd7e   : > { %v2884_v58 = vsel %vm947_vm2, %v2871_v57, -inf }
 0xd7f   : > { %2885 = vmax.xlane.f32.xlu1 %v2884_v58  ;;  %v4180_v60 = vpop.f32.mrf.mxu1  ;;  %2882 = vmax.xlane.f32.xlu0 %v2881_v59 }
 0xd90   : > { %2425 = vrot.lane.b32.xlu1 %v4929_v23, %s5253_s24 }
 0xd95   : > { %2423 = vrot.lane.b32.xlu0 %v4917_v30, %s5253_s24 }
 0xe00   : > { %v2877_v61 = vpop.xlane.xlu1 %2876 }
 0xe01   : > { %v2887_v62 = vsub.f32 %v2643_v48, %v2877_v61 }
 0xe03   : > { %v2891_v63 = vmul.f32 1.442695, %v2887_v62 }
 0xe04   : > { %v2880_v0 = vpop.xlane.xlu0 %2879 }
 0xe05   : > { %4324 = vpow2.f32 %v2891_v63  ;;  %v2888_v2 = vsub.f32 %v2719_v54, %v2880_v0 }
 0xe07   : > { %v2893_v3 = vmul.f32 1.442695, %v2888_v2 }
 0xe08   : > { %v2886_v4 = vpop.xlane.xlu1 %2885  ;;  %v2883_v5 = vpop.xlane.xlu0 %2882 }
 0xe09   : > { %4326 = vpow2.f32 %v2893_v3  ;;  %v2890_v6 = vsub.f32 %v2871_v57, %v2886_v4  ;;  %v2889_v7 = vsub.f32 %v2795_v49, %v2883_v5 }
 0xe0b   : > { %v2897_v8 = vmul.f32 1.442695, %v2890_v6  ;;  %v2895_v9 = vmul.f32 1.442695, %v2889_v7 }
 0xe0c   : > { %v2426_v16 = vpop.permute.xlu1 %2425  ;;  %v2424_v17 = vpop.permute.xlu0 %2423 }
 0xe0d   : > { %4328 = vpow2.f32 %v2897_v8 }
 0xe0e   : > { %4330 = vpow2.f32 %v2895_v9 }
 0xe12   : > { %v5007_v23 = vpop.eup %4324 }
 0xe13   : > { %v2899_v30 = vsel %vm947_vm2, %v5007_v23, 0.0 }
 0xe14   : > { %2900 = vadd.xlane.f32.xlu0 %v2899_v30 }
 0xe16   : > { %v4327_v10 = vpop.eup %4326 }
 0xe17   : > { %v2902_v11 = vsel %vm947_vm2, %v4327_v10, 0.0 }
 0xe18   : > { %2903 = vadd.xlane.f32.xlu1 %v2902_v11 }
 0xe1a   : > { %v5012_v12 = vpop.eup %4328 }
 0xe1b   : > { %v5014_v13 = vpop.eup %4330  ;;  %v2908_v14 = vsel %vm947_vm2, %v5012_v12, 0.0 }
 0xe1c   : > { %2909 = vadd.xlane.f32.xlu1 %v2908_v14  ;;  %v2905_v15 = vsel %vm947_vm2, %v5014_v13, 0.0 }
 0xe1d   : > { %2906 = vadd.xlane.f32.xlu0 %v2905_v15 }
 0xe2d   : > { %2427 = vrot.lane.b32.xlu1 %v4927_v22, %s5253_s24 }
 0xe33   : > { %2429 = vrot.lane.b32.xlu0 %v4935_v24, %s5253_s24  ;;  %s4418_s24 = smov [#allocation2]  }
 0xe34   : > { %s4348_s13 = sshll.u32 %s4418_s24, 4  ;;  %s4349_s13 = int_to_ptr.vmem [resolvable:$false] %s4348_s13 }
 0xe9d   : > { %v2901_v20 = vpop.xlane.xlu0 %2900 }
 0xe9e   : > { %4332 = vrcp.f32 %v2901_v20 }
 0xea1   : > { %v2904_v18 = vpop.xlane.xlu1 %2903 }
 0xea2   : > { %4334 = vrcp.f32 %v2904_v18 }
 0xea5   : > { %v2910_v21 = vpop.xlane.xlu1 %2909 }
 0xea6   : > { %v2907_v34 = vpop.xlane.xlu0 %2906  ;;  %4336 = vrcp.f32 %v2910_v21 }
 0xea7   : > { %4338 = vrcp.f32 %v2907_v34 }
 0xea9   : > { %v2428_v25 = vpop.permute.xlu1 %2427 }
 0xeaa   : > { %v2435_v26 = vcombine.low %v2424_v17, %v2428_v25  ;;  %v2436_v28 = vcombine.high %v2424_v17, %v2428_v25  ;;  %v2430_v29 = vpop.permute.xlu0 %2429 }
 0xeab   : > { %v2451_v31 = vcombine.low %v2426_v16, %v2430_v29  ;;  %v2452_v35 = vcombine.high %v2426_v16, %v2430_v29  ;;  %v4333_v57 = vpop.eup %4332 }
 0xeac   : > { %v2443_v27 = vrot.slane %v2435_v26, %v4651_v44  ;;  %v2450_v22 = vrot.slane %v2436_v28, %v4651_v44  ;;  %v2915_v3 = vmul.f32 %v4333_v57, %v5007_v23  ;;  %v3892_v23 = vld [vmem:[%s5240_s4 + $0x38] sm:$0xff] }
 0xead   : > { %v2459_v24 = vrot.slane %v2451_v31, %v4651_v44  ;;  %v2466_v32 = vrot.slane %v2452_v35, %v4651_v44 }
 0xeaf   : > { %v2467_v33 = vcombine.low %v2443_v27, %v2459_v24  ;;  %v2468_v37 = vcombine.high %v2443_v27, %v2459_v24  ;;  %v2483_v38 = vcombine.low %v2450_v22, %v2466_v32  ;;  %v2484_v39 = vcombine.high %v2450_v22, %v2466_v32  ;;  %v4335_v58 = vpop.eup %4334  ;;  %v3891_v22 = vld [vmem:[%s5240_s4 + $0x30] sm:$0xff]  ;;  %v3890_v24 = vld [vmem:[%s5240_s4 + $0x28] sm:$0xff] }
 0xeb0   : > { %v2916_v4 = vmul.f32 %v4335_v58, %v4327_v10 }
 0xeb1   : > { %v2475_v36 = vrot.slane %v2467_v33, %v4661_v52  ;;  %v2482_v40 = vrot.slane %v2468_v37, %v4661_v52  ;;  %v2491_v41 = vrot.slane %v2483_v38, %v4661_v52  ;;  %v2498_v42 = vrot.slane %v2484_v39, %v4661_v52 }
 0xeb3   : > { %v2503_v43 = vcombine.low %v2475_v36, %v2482_v40  ;;  %v3873_v45 = vcombine.high %v2475_v36, %v2482_v40  ;;  %v2519_v46 = vcombine.low %v2491_v41, %v2498_v42  ;;  %v3874_v47 = vcombine.high %v2491_v41, %v2498_v42  ;;  %v4337_v63 = vpop.eup %4336  ;;  %v3889_v42 = vld [vmem:[%s5240_s4 + $0x20] sm:$0xff] }
 0xeb4   : > { %v4339_v5 = vpop.eup %4338  ;;  %v2918_v9 = vmul.f32 %v4337_v63, %v5012_v12 }
 0xeb5   : > { %v2510_v48 = vrot.slane %v2503_v43, %v4651_v44  ;;  %v2518_v49 = vrot.slane %v3873_v45, %v4651_v44  ;;  %v2526_v50 = vrot.slane %v2519_v46, %v4651_v44  ;;  %v2534_v51 = vrot.slane %v3874_v47, %v4651_v44 }
 0xeb6   : > { %v2917_v8 = vmul.f32 %v4339_v5, %v5014_v13 }
 0xeb7   : > { %v2535_v53 = vcombine.low %v2510_v48, %v2518_v49  ;;  %v2551_v54 = vcombine.low %v2526_v50, %v2534_v51  ;;  %v2536_v55 = vcombine.high %v2510_v48, %v2518_v49  ;;  %v2552_v56 = vcombine.high %v2526_v50, %v2534_v51 }
 0xeb9   : > { %v2543_v59 = vrot.slane %v2535_v53, %v4661_v52  ;;  %v2559_v60 = vrot.slane %v2551_v54, %v4661_v52  ;;  %v2550_v61 = vrot.slane %v2536_v55, %v4661_v52  ;;  %v2566_v62 = vrot.slane %v2552_v56, %v4661_v52 }
 0xebb   : > { %v2567_v0 = vcombine.low %v2543_v59, %v2559_v60  ;;  %v2568_v2 = vcombine.high %v2543_v59, %v2559_v60  ;;  %v2569_v6 = vcombine.low %v2550_v61, %v2566_v62  ;;  %v2570_v7 = vcombine.high %v2550_v61, %v2566_v62 }
 0xebd   : > { %4182 = vmatpush3.msra.mxu0 %v2567_v0  ;;  %4187 = vmatpush3.msra.mxu1 %v2568_v2 }
 0xebe   : > { %4184 = vmatmul.mubr.msk.f32.vlgmr.msra.gmra.mxu0 %vm947_vm2, %v2915_v3  ;;  %4189 = vmatmul.mubr.msk.f32.vlgmr.msra.gmra.mxu1 %vm947_vm2, %v2916_v4 }
 0xebf   : > { %4191 = vmatprep.subr.mxu0 %v4406_v1  ;;  %4196 = vmatprep.subr.mxu1 %v4406_v1 }
 0xec0   : > { %4192 = vmatpush3.msra.mxu0 %v2569_v6  ;;  %4197 = vmatpush3.msra.mxu1 %v2570_v7 }
 0xec1   : > { %4193 = vmatprep.mubr.msk.f32.mxu0 %vm4407_vm0, %v4406_v1  ;;  %4198 = vmatprep.mubr.msk.f32.mxu1 %vm4407_vm0, %v4406_v1 }
 0xec2   : > { %4194 = vmatmul.mubr.msk.f32.vlgmr.msra.gmra.mxu0 %vm947_vm2, %v2917_v8  ;;  %4199 = vmatmul.mubr.msk.f32.vlgmr.msra.gmra.mxu1 %vm947_vm2, %v2918_v9 }
 0xec3   : > { %4201 = vmatprep.subr.mxu0 %v4406_v1  ;;  %4209 = vmatprep.mubr.msk.f32.mxu0 %vm4407_vm0, %v4406_v1 }
 0xec4   : > { %4212 = vmatprep.subr.mxu1 %v4406_v1  ;;  %4220 = vmatprep.mubr.msk.f32.mxu1 %vm4407_vm0, %v4406_v1 }
 0xec5   : > { %4202 = vmatpush3.msra.mxu0 %v3892_v23 }
 0xec6   : > { %4203 = vmatprep.subr.mxu0 %v4406_v1 }
 0xec7   : > { %4204 = vmatpush3.msra.mxu0 %v3891_v22  ;;  %v3904_v22 = vld [vmem:[%s5242_s6 + $0x48] sm:$0xff] }
 0xec8   : > { %4205 = vmatprep.subr.mxu0 %v4406_v1 }
 0xec9   : > { %4206 = vmatpush3.msra.mxu0 %v3890_v24  ;;  %v3903_v24 = vld [vmem:[%s5242_s6 + $0x40] sm:$0xff] }
 0xeca   : > { %4207 = vmatprep.subr.mxu0 %v4406_v1 }
 0xecb   : > { %4208 = vmatpush3.msra.mxu0 %v3889_v42 }
 0xecc   : > { %4223 = vmatprep.subr.mxu0 %v4406_v1 }
 0xf7e   : > { %v2988_v30 = vpop.f32.mrf.mxu0  ;;  %v3061_v10 = vpop.f32.mrf.mxu1 }
 0xf80   : > { %v4185_v11 = vpop.f32.mrf.mxu0  ;;  %v4190_v12 = vpop.f32.mrf.mxu1 }
 0xf81   : > { %v3900_v11 = vld [vmem:[%s5241_s5 + $0x38] sm:$0xff]  ;;  %v3899_v12 = vld [vmem:[%s5241_s5 + $0x30] sm:$0xff] }
 0xf82   : > { %v3134_v13 = vpop.f32.mrf.mxu0  ;;  %v3207_v14 = vpop.f32.mrf.mxu1  ;;  %4213 = vmatpush3.msra.mxu1 %v3900_v11 }
 0xf83   : > { %v3211_v15 = vcombine.low %v2988_v30, %v3134_v13  ;;  %v3212_v16 = vcombine.high %v2988_v30, %v3134_v13  ;;  %v3227_v17 = vcombine.low %v3061_v10, %v3207_v14  ;;  %v3228_v18 = vcombine.high %v3061_v10, %v3207_v14  ;;  %4214 = vmatprep.subr.mxu1 %v4406_v1  ;;  %v3897_v13 = vld [vmem:[%s5241_s5 + $0x20] sm:$0xff]  ;;  %v3910_v14 = vld [vmem:[%s5242_s6 + $0x78] sm:$0xff] }
 0xf84   : > { %v4195_v20 = vpop.f32.mrf.mxu0  ;;  %v4200_v21 = vpop.f32.mrf.mxu1  ;;  %4215 = vmatpush3.msra.mxu1 %v3899_v12 }
 0xf85   : > { %v3219_v34 = vrot.slane %v3211_v15, %v4651_v44  ;;  %v3226_v25 = vrot.slane %v3212_v16, %v4651_v44  ;;  %v3235_v26 = vrot.slane %v3227_v17, %v4651_v44  ;;  %v3242_v28 = vrot.slane %v3228_v18, %v4651_v44  ;;  %4216 = vmatprep.subr.mxu1 %v4406_v1  ;;  %v3909_v15 = vld [vmem:[%s5242_s6 + $0x70] sm:$0xff]  ;;  %v3908_v16 = vld [vmem:[%s5242_s6 + $0x68] sm:$0xff]  ;;  %v3907_v17 = vld [vmem:[%s5242_s6 + $0x60] sm:$0xff] }
 0xf86   : > { %v3906_v18 = vld [vmem:[%s5242_s6 + $0x58] sm:$0xff] }
 0xf87   : > { %v3243_v29 = vcombine.low %v3219_v34, %v3235_v26  ;;  %v3244_v31 = vcombine.high %v3219_v34, %v3235_v26  ;;  %v3259_v35 = vcombine.low %v3226_v25, %v3242_v28  ;;  %v3260_v27 = vcombine.high %v3226_v25, %v3242_v28  ;;  %v3895_v26 = vld [vmem:[%s5244_s8 + $0xb] ss:$0 sm:$0xff] }
 0xf89   : > { %v3251_v32 = vrot.slane %v3243_v29, %v4661_v52  ;;  %v3258_v33 = vrot.slane %v3244_v31, %v4661_v52  ;;  %v3267_v37 = vrot.slane %v3259_v35, %v4661_v52  ;;  %v3274_v38 = vrot.slane %v3260_v27, %v4661_v52  ;;  %v3896_v29 = vld [vmem:[%s5244_s8 + $0xc] ss:$0 sm:$0xff]  ;;  %v3905_v27 = vld [vmem:[%s5242_s6 + $0x50] sm:$0xff] }
 0xf8b   : > { %v3279_v39 = vcombine.low %v3251_v32, %v3258_v33  ;;  %v3887_v36 = vcombine.high %v3251_v32, %v3258_v33  ;;  %v3295_v40 = vcombine.low %v3267_v37, %v3274_v38  ;;  %v3888_v41 = vcombine.high %v3267_v37, %v3274_v38  ;;  %v3901_v32 = vld [vmem:[%s5244_s8 + $0xd] ss:$0 sm:$0xff] }
 0xf8d   : > { %v3286_v43 = vrot.slane %v3279_v39, %v4651_v44  ;;  %v3294_v45 = vrot.slane %v3887_v36, %v4651_v44  ;;  %v3302_v46 = vrot.slane %v3295_v40, %v4651_v44  ;;  %v3310_v47 = vrot.slane %v3888_v41, %v4651_v44  ;;  %v3911_v36 = vld [vmem:[%s5244_s8 + $0xe] ss:$0 sm:$0xff] }
 0xf8f   : > { %v3312_v48 = vcombine.high %v3286_v43, %v3294_v45  ;;  %v3328_v49 = vcombine.high %v3302_v46, %v3310_v47  ;;  %v3311_v50 = vcombine.low %v3286_v43, %v3294_v45  ;;  %v3327_v51 = vcombine.low %v3302_v46, %v3310_v47 }
 0xf91   : > { %v3326_v53 = vrot.slane %v3312_v48, %v4661_v52  ;;  %v3342_v54 = vrot.slane %v3328_v49, %v4661_v52  ;;  %v3319_v55 = vrot.slane %v3311_v50, %v4661_v52  ;;  %v3335_v56 = vrot.slane %v3327_v51, %v4661_v52  ;;  %v3893_v52 = vld [vmem:[%s5244_s8 + $0xa] ss:$0 sm:$0xff]  ;;  %v3671_v51 = vld [vmem:[%s5243_s7 + $0x18] sm:$0xff] }
 0xf93   : > { %v3345_v57 = vcombine.low %v3326_v53, %v3342_v54  ;;  %v3344_v58 = vcombine.high %v3319_v55, %v3335_v56  ;;  %v3343_v59 = vcombine.low %v3319_v55, %v3335_v56  ;;  %v3346_v44 = vcombine.high %v3326_v53, %v3342_v54  ;;  %v3670_v53 = vld [vmem:[%s5243_s7 + $0x10] sm:$0xff]  ;;  %v3669_v54 = vld [vmem:[%s5243_s7 + $0x8] sm:$0xff]  ;;  %v3668_v55 = vld [vmem:[%s5243_s7] sm:$0xff] }
 0xf95   : > { %3352 = vrot.lane.b32.xlu0 %v3345_v57, %s5254_s21  ;;  %3348 = vrot.lane.b32.xlu1 %v3344_v58, %s5255_s14  ;;  %s321_s14 = sand.u32 1, %s4396_s10  }
 0xf96   : > { %s3752_s22 = scalar_lea.sflag [#allocation3], %s321_s14 }
 0xf99   : > { %3356 = vrot.lane.b32.xlu1 %v3346_v44, %s5256_s28  ;;  %v3913_v44 = vld [vmem:[%s5244_s8 + $0xf] ss:$0 sm:$0xff]  ;;  %s3828_s28 = sshll.u32 %s321_s14, 3 }
 0xf9a   : > { %s323_s27 = scalar_lea.vmem [#allocation2], %s3828_s28  ;;  %s4350_s28 = scalar_lea.vmem %s4349_s13, 256 }
 0xf9b   : > { %s3765_s16 = sshll.u32 %s323_s27, 4  ;;  %s3766_s16 = int_to_ptr.vmem [resolvable:$true] %s3765_s16 }
 0xf9c   : > { %s4344_s21 = scalar_lea.vmem %s3766_s16, 128  ;;  %p4351_p0 = scmp.lt.s32.totalorder %s3766_s16, %s4349_s13 }
 0xf9d   : > { %p4345_p11 = scmp.ne.s32.totalorder %s3766_s16, %s4344_s21  ;;  %p4352_p1 = scmp.lt.s32.totalorder %s4350_s28, %s4344_s21 }
 0xf9f   : > { %p4346_p12 = pnand %p4345_p11, %p4507_p5  ;;  %p4353_p2 = por %p4352_p1, %p4351_p0 }
 0xfa1   : > { %p4347_p13 = pneg %p4346_p12 }
 0xfa3   : > { %p4354_p3 = pnand %p4353_p2, %p4347_p13 }
0x1007   : > { %v3349_v60 = vpop.permute.xlu1 %3348  ;;  %v3353_v61 = vpop.permute.xlu0 %3352 }
0x1008   : > { %v3359_v62 = vsel %vm947_vm2, %v3343_v59, %v3349_v60 }
0x1009   : > { %v3360_v0 = vsel %vm1737_vm3, %v3359_v62, %v3353_v61  ;;  %v3914_v61 = vld [vmem:[%s5244_s8 + $0x10] ss:$0 sm:$0xff] }
0x100b   : > { %v3357_v63 = vpop.permute.xlu1 %3356 }
0x100c   : > { %v3361_v2 = vsel %vm1739_vm4, %v3360_v0, %v3357_v63 }
0x100d   : > { %4210 = vmatmul.mubr.msk.f32.vlgmr.msra.gmra.mxu0 %vm431_vm1, %v3361_v2 }
0x100e   : > { %4239 = vmatprep.mubr.msk.f32.mxu0 %vm4407_vm0, %v4406_v1  ;;  %4224 = vmatpush3.msra.mxu0 %v3910_v14 }
0x100f   : > { %4225 = vmatprep.subr.mxu0 %v4406_v1 }
0x1010   : > { %4226 = vmatpush3.msra.mxu0 %v3909_v15 }
0x1011   : > { %4227 = vmatprep.subr.mxu0 %v4406_v1 }
0x1012   : > { %4228 = vmatpush3.msra.mxu0 %v3908_v16 }
0x1013   : > { %4229 = vmatprep.subr.mxu0 %v4406_v1 }
0x1014   : > { %4230 = vmatpush3.msra.mxu0 %v3907_v17 }
0x1015   : > { %4231 = vmatprep.subr.mxu0 %v4406_v1 }
0x1016   : > { %4232 = vmatpush3.msra.mxu0 %v3906_v18 }
0x1017   : > { %4233 = vmatprep.subr.mxu0 %v4406_v1 }
0x1018   : > { %4234 = vmatpush3.msra.mxu0 %v3905_v27 }
0x1019   : > { %4235 = vmatprep.subr.mxu0 %v4406_v1 }
0x101a   : > { %4236 = vmatpush3.msra.mxu0 %v3904_v22 }
0x101b   : > { %4237 = vmatprep.subr.mxu0 %v4406_v1 }
0x101c   : > { %4238 = vmatpush3.msra.mxu0 %v3903_v24 }
0x10cd   : > { %v3441_v3 = vpop.f32.mrf.mxu0 }
0x10ce   : > { %v3442_v4 = vadd.f32 %v3893_v52, %v3441_v3 }
0x10cf   : > { %v4211_v5 = vpop.f32.mrf.mxu0 }
0x10d0   : > { %v3445_v6 = vadd.f32 %v3442_v4, %v4908_v19  ;;  %v3898_v19 = vld [vmem:[%s5241_s5 + $0x28] sm:$0xff] }
0x10d1   : > { %4217 = vmatpush3.msra.mxu1 %v3898_v19 }
0x10d2   : > { %v3448_v7 = vsel %vm431_vm1, %v3445_v6, 0.0  ;;  %4218 = vmatprep.subr.mxu1 %v4406_v1 }
0x10d3   : > { %3449 = vadd.xlane.f32.xlu0 %v3448_v7  ;;  %4219 = vmatpush3.msra.mxu1 %v3897_v13 }
0x10d4   : > { %4242 = vmatprep.subr.mxu1 %v4406_v1 }
0x115c   : > { %v3450_v8 = vpop.xlane.xlu0 %3449 }
0x115d   : > { %v3451_v9 = vmul.f32 0.03125, %v3450_v8 }
0x115f   : > { %v3452_v23 = vsub.f32 %v3445_v6, %v3451_v9 }
0x1161   : > { %v3453_v30 = vmul.f32 %v3452_v23, %v3452_v23 }
0x1163   : > { %v3454_v10 = vsel %vm431_vm1, %v3453_v30, 0.0 }
0x1164   : > { %3455 = vadd.xlane.f32.xlu1 %v3454_v10 }
0x11ed   : > { %v3456_v20 = vpop.xlane.xlu1 %3455 }
0x11ee   : > { %v3457_v21 = vmul.f32 0.03125, %v3456_v20 }
0x11f0   : > { %v3458_v34 = vadd.f32 1e-05, %v3457_v21 }
0x11f2   : > { %4340 = vrsqrt.f32 %v3458_v34 }
0x11ff   : > { %v4341_v25 = vpop.eup %4340 }
0x1200   : > { %v3460_v28 = vmul.f32 %v4341_v25, %v3452_v23 }
0x1202   : > { %v3465_v31 = vmul.f32 %v3895_v26, %v3460_v28 }
0x1204   : > { %v3470_v35 = vadd.f32 %v3896_v29, %v3465_v31 }
0x1206   : > { %4221 = vmatmul.mubr.msk.f32.vlgmr.msra.gmra.mxu1 %vm431_vm1, %v3470_v35 }
0x1207   : > { %4250 = vmatprep.mubr.msk.f32.mxu1 %vm4407_vm0, %v4406_v1  ;;  %4243 = vmatpush3.msra.mxu1 %v3671_v51 }
0x1208   : > { %4244 = vmatprep.subr.mxu1 %v4406_v1 }
0x1209   : > { %4245 = vmatpush3.msra.mxu1 %v3670_v53 }
0x120a   : > { %4246 = vmatprep.subr.mxu1 %v4406_v1 }
0x120b   : > { %4247 = vmatpush3.msra.mxu1 %v3669_v54 }
0x120c   : > { %4248 = vmatprep.subr.mxu1 %v4406_v1  ;;  %v3915_v1 = vld [vmem:[%s5244_s8 + $0x11] ss:$0 sm:$0xff] }
0x120d   : > { %4249 = vmatpush3.msra.mxu1 %v3668_v55 }
0x12c6   : > { %v3550_v33 = vpop.f32.mrf.mxu1 }
0x12c7   : > { %v3551_v37 = vadd.f32 %v3901_v32, %v3550_v33 }
0x12c8   : > { %v4222_v38 = vpop.f32.mrf.mxu1 }
0x12c9   : > { %v3554_v39 = vmax.f32 %v3551_v37, 0.0 }
0x12cb   : > { %4240 = vmatmul.mubr.msk.f32.vlgmr.msra.gmra.mxu0 %vm1946_vm5, %v3554_v39 }
0x138b   : > { %v3638_v40 = vpop.f32.mrf.mxu0 }
0x138c   : > { %v3639_v41 = vadd.f32 %v3911_v36, %v3638_v40 }
0x138d   : > { %v4241_v42 = vpop.f32.mrf.mxu0 }
0x138e   : > { %v3642_v43 = vadd.f32 %v3639_v41, %v3470_v35 }
0x1390   : > { %v3645_v45 = vsel %vm431_vm1, %v3642_v43, 0.0 }
0x1391   : > { %3646 = vadd.xlane.f32.xlu0 %v3645_v45 }
0x141a   : > { %v3647_v46 = vpop.xlane.xlu0 %3646 }
0x141b   : > { %v3648_v47 = vmul.f32 0.03125, %v3647_v46 }
0x141d   : > { %v3649_v48 = vsub.f32 %v3642_v43, %v3648_v47 }
0x141f   : > { %v3650_v49 = vmul.f32 %v3649_v48, %v3649_v48 }
0x1421   : > { %v3651_v50 = vsel %vm431_vm1, %v3650_v49, 0.0 }
0x1422   : > { %3652 = vadd.xlane.f32.xlu0 %v3651_v50 }
0x14ab   : > { %v3653_v56 = vpop.xlane.xlu0 %3652 }
0x14ac   : > { %v3654_v57 = vmul.f32 0.03125, %v3653_v56 }
0x14ae   : > { %v3655_v58 = vadd.f32 1e-05, %v3654_v57 }
0x14b0   : > { %4342 = vrsqrt.f32 %v3655_v58 }
0x14bd   : > { %v4343_v59 = vpop.eup %4342 }
0x14be   : > { %v3657_v60 = vmul.f32 %v4343_v59, %v3649_v48 }
0x14c0   : > { %v3662_v62 = vmul.f32 %v3913_v44, %v3657_v60 }
0x14c2   : > { %v3667_v63 = vadd.f32 %v3914_v61, %v3662_v62 }
0x14c4   : > { %4251 = vmatmul.mubr.msk.f32.vlgmr.msra.gmra.mxu1 %vm431_vm1, %v3667_v63 }
0x1584   : > { %v3746_v0 = vpop.f32.mrf.mxu1 }
0x1585   : > { %v3747_v2 = vadd.f32 %v3915_v1, %v3746_v0 }
0x1586   : > { %v4252_v52 = vpop.f32.mrf.mxu1 }
0x1587   : > { %3750 = vst [vmem:[%s323_s27] sm:$0xff] %v3747_v2 }
0x1588   : > { %4357 = shalt.err (!%p4354_p3)
}
0x1589   : > { %s4358_s25 = scalar_lea.hbm %s5201_s29, 128  ;;  %s4362_s27 = scalar_lea.hbm %s5245_s9, 256 }
0x158a   : > { %p4359_p4 = scmp.ne.s32.totalorder %s5201_s29, %s4358_s25  ;;  %p4363_p9 = scmp.lt.s32.totalorder %s5201_s29, %s5245_s9 }
0x158b   : > { %p4364_p10 = scmp.lt.s32.totalorder %s4362_s27, %s4358_s25 }
0x158c   : > { %p4360_p7 = pnand %p4359_p4, %p4507_p5 }
0x158d   : > { %p4365_p11 = por %p4364_p10, %p4363_p9 }
0x158e   : > { %p4361_p8 = pneg %p4360_p7 }
0x1590   : > { %p4366_p12 = pnand %p4365_p11, %p4361_p8 }
0x1592   : > { %4369 = shalt.err (!%p4366_p12)
}
0x1593   : > { %4253 = dma.vmem_to_hbm [thread:$0]  (%p4507_p5), %s3766_s16, 128, %s5201_s29, %s3752_s22  }
0x1594 PF: > { %p4259_p13 = scmp.ge.s32.totalorder %s4404_s12, 2  ;;  %s3777_s21 = sand.u32 1, %s4392_s30  }
0x1595   : > { %s3778_s24 = scalar_lea.sflag [#allocation3], %s3777_s21 }
0x1596   : > { %p4256_p0 = pnand %p4259_p13, %p4511_p6 }
0x1598   : > { %p4257_p1 = pneg %p4256_p0 }
0x159a   : > { %4387 = dma.done.wait (%p4257_p1), %s3778_s24, 128  }
0x159b   : > { %4389 = vsyncadd (%p4257_p1), %s3778_s24, 4294967168  ;;  %p19_p2 = scmp.ge.s32.totalorder %s4494_s15, 4   ;;  %s5257_s30 = smov %s4396_s10 }
0x159c   : > { %s5258_s10 = smov %s4400_s11  ;;  %s5259_s11 = smov %s4505_s18 }
0x159d   : > { %s5260_s12 = smov %s4494_s15  ;;  %21 = sbr.rel (!%p19_p2) target bundleno = 3 (0x3), region = 95 }
0x15a2   :  { %3783 = vsyncpa [#allocation3], 1 }
0x15a3   :  { %3785 = vsyncpa [#allocation3 + $0x1], 1 }

</bundles_post_ra>
